<compile_context>
chip_gen: v6e
topology: v6e:2x2x1
jax: 0.10.0
libtpu: 0.0.40
codegen_flags: <defaults>
</compile_context>

<pallas_src>
import functools
import math

import jax
import jax.numpy as jnp
from jax import lax
from jax.experimental import pallas as pl
from jax.experimental.pallas import tpu as pltpu


# ----------------------------- kernel ------------------------------------- #

def _layernorm(x, gamma, beta, eps=1e-5):
    mu = jnp.mean(x, axis=-1, keepdims=True)
    var = jnp.mean(jnp.square(x - mu), axis=-1, keepdims=True)
    return (x - mu) * lax.rsqrt(var + eps) * gamma + beta


def _gelu_tanh(x):
    c = math.sqrt(2.0 / math.pi)
    return 0.5 * x * (1.0 + jnp.tanh(c * (x + 0.044715 * x * x * x)))


def block_kernel(S, E, H, Dh, TQ, compute_dtype, has_mask, *refs):
    idx = 0
    x_ref = refs[idx]; idx += 1
    mask_ref = None
    if has_mask:
        mask_ref = refs[idx]; idx += 1
    (ga_ref, ba_ref, gm_ref, bm_ref,
     wq_ref, wk_ref, wv_ref, bq_ref, bk_ref, bv_ref,
     wo_ref, bo_ref, w1_ref, b1_ref, w2_ref, b2_ref,
     out_ref, k_out_ref, v_out_ref,
     hn_ref, ctx_ref) = refs[idx:]

    cdt = compute_dtype
    f32 = jnp.float32
    scale = 1.0 / math.sqrt(Dh)

    q_idx = pl.program_id(1)
    q0 = pl.multiple_of(q_idx * TQ, TQ)

    # -------- per-batch prologue (q-axis is 'arbitrary', innermost): --------
    # ln_a over the full sequence + grouped K/V projections, computed ONCE per
    # batch, cached in VMEM scratch / the resident present-output blocks.
    @pl.when(q_idx == 0)
    def _():
        x_full = x_ref[0]                                      # (S, E) f32
        hn = _layernorm(x_full, ga_ref[...], ba_ref[...])      # (S, E) f32
        hn_c = hn.astype(cdt)
        hn_ref[...] = hn_c
        k_full = jnp.dot(hn_c, wk_ref[...],
                         preferred_element_type=f32) + bk_ref[...]   # (S, E)
        v_full = jnp.dot(hn_c, wv_ref[...],
                         preferred_element_type=f32) + bv_ref[...]   # (S, E)
        for h in range(H):   # lane-dense [H, S, Dh] present-cache layout
            k_out_ref[0, h] = k_full[:, h * Dh:(h + 1) * Dh].astype(k_out_ref.dtype)
            v_out_ref[0, h] = v_full[:, h * Dh:(h + 1) * Dh].astype(v_out_ref.dtype)

    # -------- per query-tile work --------
    x_q = x_ref[0, pl.ds(q0, TQ), :]                           # (TQ, E) residual
    hn_q = hn_ref[pl.ds(q0, TQ), :]                            # (TQ, E) cdt (cached)

    # grouped Q projection: one (TQ,E)@(E,E) dot, heads sliced afterwards.
    q_all = (jnp.dot(hn_q, wq_ref[...], preferred_element_type=f32)
             + bq_ref[...]).astype(cdt)                        # (TQ, E)

    # additive attention bias: causal pattern generated in-kernel (no S^2 HBM
    # stream); optional user mask arrives already tiled to (TQ, S).
    rows = q0 + lax.broadcasted_iota(jnp.int32, (TQ, S), 0)
    cols = lax.broadcasted_iota(jnp.int32, (TQ, S), 1)
    bias = jnp.where(rows >= cols, 0.0, -1e9).astype(f32)
    if has_mask:
        bias = bias + mask_ref[0]

    # per-head attention; ctx heads assembled in a VMEM scratch buffer so the
    # live set per head stays small and the output projection is one fused dot
    for h in range(H):
        q_h = q_all[:, h * Dh:(h + 1) * Dh]                    # (TQ, Dh) cdt
        k_h = k_out_ref[0, h].astype(cdt)                      # (S, Dh)
        v_h = v_out_ref[0, h].astype(cdt)                      # (S, Dh)

        s = jnp.einsum('qd,kd->qk', q_h, k_h,
                       preferred_element_type=f32) * scale + bias
        m = jnp.max(s, axis=-1, keepdims=True)
        p = jnp.exp(s - m)
        l = jnp.sum(p, axis=-1, keepdims=True)
        ctx_h = jnp.dot(p.astype(cdt), v_h, preferred_element_type=f32)
        # normalize the (TQ,Dh) context, not the (TQ,S) probabilities.
        ctx_h = ctx_h * pl.reciprocal(l, approx=True)
        ctx_ref[:, h * Dh:(h + 1) * Dh] = ctx_h.astype(cdt)

    # fused output projection: one (TQ,E)@(E,E) dot.
    attn = (jnp.dot(ctx_ref[...], wo_ref[...], preferred_element_type=f32)
            + bo_ref[...])                                     # (TQ, E) f32

    # ---- ln_m + MLP on this query tile ----
    mix = attn + x_q
    nm = _layernorm(mix, gm_ref[...], bm_ref[...])
    h1 = jnp.dot(nm.astype(cdt), w1_ref[...],
                 preferred_element_type=f32) + b1_ref[...]
    h1 = _gelu_tanh(h1)
    ff = jnp.dot(h1.astype(cdt), w2_ref[...],
                 preferred_element_type=f32) + b2_ref[...]

    # ---- block output: residual + (attn_output + feed_forward) ----
    out_ref[0] = (x_q + attn + ff).astype(out_ref.dtype)


# ----------------------------- wrapper ------------------------------------ #

def block_forward(x, params, attention_mask=None,
                  matmul_dtype=jnp.bfloat16, q_tile=128, present_dtype=None):
    """x: [B, S, E].  attention_mask: optional additive mask, shape [B, S, S]
    or [S, S].  Returns (output [B,S,E], present=(k [B,H,S,Dh], v [B,H,S,Dh]))."""
    B, S, E = x.shape
    H = params["H"]
    assert E % H == 0
    Dh = E // H
    F = params["w1"].shape[1]

    TQ = min(S, q_tile)
    assert S % TQ == 0 and (TQ == S or TQ % 8 == 0)
    QT = S // TQ

    f32 = jnp.float32
    cdt = matmul_dtype
    pdt = present_dtype if present_dtype is not None else x.dtype

    # Split the fused qkv projection into grouped (E,E) weights (plain JAX,
    # outside the kernel) -> grouped in-kernel matmuls, heads sliced by lanes.
    wqkv = params["wqkv"]
    bqkv = params["bqkv"].reshape(3 * E)
    wq = wqkv[:, 0 * E:1 * E].astype(cdt)
    wk = wqkv[:, 1 * E:2 * E].astype(cdt)
    wv = wqkv[:, 2 * E:3 * E].astype(cdt)
    bq = bqkv[0 * E:1 * E].reshape(1, E).astype(f32)
    bk = bqkv[1 * E:2 * E].reshape(1, E).astype(f32)
    bv = bqkv[2 * E:3 * E].reshape(1, E).astype(f32)
    wo = params["wo"].astype(cdt)
    bo = params["bo"].astype(f32)
    w1 = params["w1"].astype(cdt)
    b1 = params["b1"].astype(f32)
    w2 = params["w2"].astype(cdt)
    b2 = params["b2"].astype(f32)
    ga, ba = params["ga"].astype(f32), params["ba"].astype(f32)
    gm, bm = params["gm"].astype(f32), params["bm"].astype(f32)

    # Grid-invariant weights: constant index map + single buffering.
    def const_spec(a):
        nd = a.ndim
        return pl.BlockSpec(a.shape, lambda b, q, _nd=nd: (0,) * _nd,
                            pipeline_mode=pl.Buffered(1))

    inputs = [x]
    in_specs = [pl.BlockSpec((1, S, E), lambda b, q: (b, 0, 0))]

    has_mask = attention_mask is not None
    mask = None
    if has_mask:
        mask = jnp.asarray(attention_mask, f32)
        if mask.ndim == 2:
            mask = mask[None]
        inputs.append(mask)
        # Tiled (1, TQ, S) mask block instead of a whole (S,S) slab in VMEM.
        if mask.shape[0] == 1:
            in_specs.append(pl.BlockSpec((1, TQ, S), lambda b, q: (0, q, 0)))
        else:
            in_specs.append(pl.BlockSpec((1, TQ, S), lambda b, q: (b, q, 0)))

    weights = [ga, ba, gm, bm, wq, wk, wv, bq, bk, bv, wo, bo, w1, b1, w2, b2]
    inputs += weights
    in_specs += [const_spec(w) for w in weights]

    # present k/v blocks are resident across the (arbitrary) q axis: written
    # once at q==0, read back by every query tile of the same batch.
    out_specs = [
        pl.BlockSpec((1, TQ, E), lambda b, q: (b, q, 0)),
        pl.BlockSpec((1, H, S, Dh), lambda b, q: (b, 0, 0, 0)),
        pl.BlockSpec((1, H, S, Dh), lambda b, q: (b, 0, 0, 0)),
    ]
    out_shape = (
        jax.ShapeDtypeStruct((B, S, E), x.dtype),
        jax.ShapeDtypeStruct((B, H, S, Dh), pdt),
        jax.ShapeDtypeStruct((B, H, S, Dh), pdt),
    )

    scratch_shapes = [
        pltpu.VMEM((S, E), cdt),    # cached ln_a(x) for the whole sequence
        pltpu.VMEM((TQ, E), cdt),   # ctx heads of the current query tile
    ]

    # --- computed VMEM budget (resident weights + blocks + scratch + live
    #     intermediates), with headroom; capped below physical VMEM. ---------
    cb = jnp.dtype(cdt).itemsize
    pb = jnp.dtype(pdt).itemsize
    need = 0
    need += 2 * S * E * 4                                   # x block (2-buf)
    if has_mask:
        need += 2 * TQ * S * 4                              # mask tile (2-buf)
    need += sum(int(w.size) * w.dtype.itemsize for w in weights)  # 1-buffered
    need += 2 * TQ * E * 4                                  # out block (2-buf)
    need += 2 * 2 * S * E * pb                              # resident k/v present
    need += S * E * cb + TQ * E * cb                        # scratch
    need += 4 * TQ * S * 4 + 2 * TQ * F * 4 + 3 * S * E * 4  # live temporaries
    vmem_limit = max(32 << 20, min(int(need * 1.5) + (8 << 20), 100 << 20))

    # Advisory cost estimate (now matches the work actually done: K/V are
    # computed once per batch).
    flops = (2 * B * S * E * (3 * E)       # q/k/v projections
             + 4 * B * S * S * E           # QK^T and PV
             + 2 * B * S * E * E           # output projection
             + 4 * B * S * E * F)          # MLP
    bytes_accessed = 4 * x.size + 4 * B * S * E + 2 * B * S * E * pb
    bytes_accessed += sum(int(w.size) * w.dtype.itemsize for w in weights)
    if has_mask:
        bytes_accessed += int(mask.size) * 4
    cost = pl.CostEstimate(flops=int(flops),
                           transcendentals=int(B * H * S * S + B * S * F),
                           bytes_accessed=int(bytes_accessed))

    kernel = functools.partial(block_kernel, S, E, H, Dh, TQ, cdt, has_mask)
    out, k_present, v_present = pl.pallas_call(
        kernel,
        out_shape=out_shape,
        grid_spec=pltpu.PrefetchScalarGridSpec(
            num_scalar_prefetch=0,
            grid=(B, QT),
            in_specs=in_specs,
            out_specs=out_specs,
            scratch_shapes=scratch_shapes,
        ),
        compiler_params=pltpu.CompilerParams(
            # q axis must be 'arbitrary': present k/v + scratch are reused
            # across q steps of the same batch.  B stays 'parallel' (megacore).
            dimension_semantics=("parallel", "arbitrary"),
            vmem_limit_bytes=vmem_limit),
        cost_estimate=cost,
    )(*inputs)
    return out, (k_present, v_present)


# ----------------------------- pure-JAX reference -------------------------- #

def block_reference(x, params, attention_mask=None):
    B, S, E = x.shape
    H = params["H"]
    Dh = E // H

    def ln(h, g, b):
        mu = jnp.mean(h, axis=-1, keepdims=True)
        var = jnp.mean(jnp.square(h - mu), axis=-1, keepdims=True)
        return (h - mu) * lax.rsqrt(var + 1e-5) * g + b

    hn = ln(x, params["ga"], params["ba"])
    qkv = hn @ params["wqkv"] + params["bqkv"]
    q, k, v = jnp.split(qkv, 3, axis=-1)
    qh = q.reshape(B, S, H, Dh).transpose(0, 2, 1, 3)
    kh = k.reshape(B, S, H, Dh).transpose(0, 2, 1, 3)
    vh = v.reshape(B, S, H, Dh).transpose(0, 2, 1, 3)

    causal = jnp.where(jnp.tril(jnp.ones((S, S), bool)), 0.0, -1e9).astype(jnp.float32)
    bias = causal[None, None]
    if attention_mask is not None:
        am = jnp.asarray(attention_mask, jnp.float32)
        if am.ndim == 2:
            am = am[None]
        bias = bias + am[:, None]

    s = jnp.einsum("bhqd,bhkd->bhqk", qh, kh) / math.sqrt(Dh) + bias
    p = jax.nn.softmax(s, axis=-1)
    ctx = jnp.einsum("bhqk,bhkd->bhqd", p, vh).transpose(0, 2, 1, 3).reshape(B, S, E)
    attn_out = ctx @ params["wo"] + params["bo"]
    mix = attn_out + x
    nm = ln(mix, params["gm"], params["bm"])
    h1 = nm @ params["w1"] + params["b1"]
    c = math.sqrt(2.0 / math.pi)
    h1 = 0.5 * h1 * (1.0 + jnp.tanh(c * (h1 + 0.044715 * h1 ** 3)))
    ff = h1 @ params["w2"] + params["b2"]
    return x + attn_out + ff, (kh, vh)


# ----------------------------- main ---------------------------------------- #

if __name__ == "__main__":
    B, S, E, H = 2, 8, 32, 4
    F = 4 * E

    key = jax.random.PRNGKey(0)
    ks = jax.random.split(key, 10)
    f32 = jnp.float32

    params = {
        "H": H,
        "ga": jnp.ones((1, E), f32), "ba": jnp.zeros((1, E), f32),   # ln_a
        "gm": jnp.ones((1, E), f32), "bm": jnp.zeros((1, E), f32),   # ln_m
        "wqkv": 0.05 * jax.random.normal(ks[0], (E, 3 * E), f32),
        "bqkv": 0.01 * jax.random.normal(ks[5], (1, 3 * E), f32),
        "wo": 0.05 * jax.random.normal(ks[1], (E, E), f32),
        "bo": jnp.zeros((1, E), f32),
        "w1": 0.05 * jax.random.normal(ks[2], (E, F), f32),
        "b1": jnp.zeros((1, F), f32),
        "w2": 0.05 * jax.random.normal(ks[3], (F, E), f32),
        "b2": jnp.zeros((1, E), f32),
    }
    x = jax.random.normal(ks[4], (B, S, E), f32)

    # --- path 1: attention_mask=None (module default), f32 matmuls ---------
    out, (kp, vp) = block_forward(x, params, attention_mask=None,
                                  matmul_dtype=jnp.float32)
    out = jax.block_until_ready(out)
    jax.block_until_ready(kp)
    jax.block_until_ready(vp)
    ref_out, (ref_k, ref_v) = block_reference(x, params, None)
    assert jnp.allclose(out, ref_out, atol=2e-3, rtol=2e-3), "output mismatch (f32)"
    assert jnp.allclose(kp, ref_k, atol=2e-3, rtol=2e-3), "present-k mismatch (f32)"
    assert jnp.allclose(vp, ref_v, atol=2e-3, rtol=2e-3), "present-v mismatch (f32)"

    # --- path 2: user additive mask + default bf16 matmul operands ---------
    user_mask = 0.5 * jax.random.normal(ks[6], (B, S, S), f32)
    out_b, (kp_b, vp_b) = block_forward(x, params, attention_mask=user_mask)
    out_b = jax.block_until_ready(out_b)
    jax.block_until_ready(kp_b)
    jax.block_until_ready(vp_b)
    ref_out_b, (ref_k_b, ref_v_b) = block_reference(x, params, user_mask)
    assert jnp.allclose(out_b, ref_out_b, atol=3e-2, rtol=3e-2), "output mismatch (bf16)"
    assert jnp.allclose(kp_b, ref_k_b, atol=3e-2, rtol=3e-2), "present-k mismatch (bf16)"
    assert jnp.allclose(vp_b, ref_v_b, atol=3e-2, rtol=3e-2), "present-v mismatch (bf16)"

    # --- path 3: longer sequence -> multiple query tiles per batch, which
    #     exercises the per-batch K/V cache reuse across the 'arbitrary' axis.
    S2 = 16
    x2 = jax.random.normal(ks[7], (B, S2, E), f32)
    mask2 = 0.5 * jax.random.normal(ks[8], (B, S2, S2), f32)
    out2, (kp2, vp2) = block_forward(x2, params, attention_mask=mask2,
                                     matmul_dtype=jnp.float32, q_tile=8)
    out2 = jax.block_until_ready(out2)
    jax.block_until_ready(kp2)
    jax.block_until_ready(vp2)
    ref_out2, (ref_k2, ref_v2) = block_reference(x2, params, mask2)
    assert jnp.allclose(out2, ref_out2, atol=2e-3, rtol=2e-3), "output mismatch (tiled)"
    assert jnp.allclose(kp2, ref_k2, atol=2e-3, rtol=2e-3), "present-k mismatch (tiled)"
    assert jnp.allclose(vp2, ref_v2, atol=2e-3, rtol=2e-3), "present-v mismatch (tiled)"

    print("KERNEL_OK")
</pallas_src>

<mosaic_0001>
module attributes {stable_mosaic.version = 11 : i64} {
  func.func @block_kernel(%arg0: i32, %arg1: i32, %arg2: memref<1x8x32xf32, #tpu.memory_space<vmem>>, %arg3: memref<1x32xf32, #tpu.memory_space<vmem>>, %arg4: memref<1x32xf32, #tpu.memory_space<vmem>>, %arg5: memref<1x32xf32, #tpu.memory_space<vmem>>, %arg6: memref<1x32xf32, #tpu.memory_space<vmem>>, %arg7: memref<32x32xf32, #tpu.memory_space<vmem>>, %arg8: memref<32x32xf32, #tpu.memory_space<vmem>>, %arg9: memref<32x32xf32, #tpu.memory_space<vmem>>, %arg10: memref<1x32xf32, #tpu.memory_space<vmem>>, %arg11: memref<1x32xf32, #tpu.memory_space<vmem>>, %arg12: memref<1x32xf32, #tpu.memory_space<vmem>>, %arg13: memref<32x32xf32, #tpu.memory_space<vmem>>, %arg14: memref<1x32xf32, #tpu.memory_space<vmem>>, %arg15: memref<32x128xf32, #tpu.memory_space<vmem>>, %arg16: memref<1x128xf32, #tpu.memory_space<vmem>>, %arg17: memref<128x32xf32, #tpu.memory_space<vmem>>, %arg18: memref<1x32xf32, #tpu.memory_space<vmem>>, %arg19: memref<1x8x32xf32, #tpu.memory_space<vmem>>, %arg20: memref<1x4x8x8xf32, #tpu.memory_space<vmem>>, %arg21: memref<1x4x8x8xf32, #tpu.memory_space<vmem>>, %arg22: memref<8x32xf32, #tpu.memory_space<vmem>>, %arg23: memref<8x32xf32, #tpu.memory_space<vmem>>) attributes {dimension_semantics = [#tpu.dimension_semantics<parallel>, #tpu.dimension_semantics<arbitrary>], iteration_bounds = array<i64: 2, 1>, scalar_prefetch = 0 : i64, scratch_operands = 2 : i64, tpu.core_type = #tpu.core_type<tc>, window_params = [{transform_indices = @transform_0, window_bounds = array<i64: 1, 8, 32>}, {pipeline_mode = #tpu.pipeline_mode<synchronous>, transform_indices = @transform_1, window_bounds = array<i64: 1, 32>}, {pipeline_mode = #tpu.pipeline_mode<synchronous>, transform_indices = @transform_2, window_bounds = array<i64: 1, 32>}, {pipeline_mode = #tpu.pipeline_mode<synchronous>, transform_indices = @transform_3, window_bounds = array<i64: 1, 32>}, {pipeline_mode = #tpu.pipeline_mode<synchronous>, transform_indices = @transform_4, window_bounds = array<i64: 1, 32>}, {pipeline_mode = #tpu.pipeline_mode<synchronous>, transform_indices = @transform_5, window_bounds = array<i64: 32, 32>}, {pipeline_mode = #tpu.pipeline_mode<synchronous>, transform_indices = @transform_6, window_bounds = array<i64: 32, 32>}, {pipeline_mode = #tpu.pipeline_mode<synchronous>, transform_indices = @transform_7, window_bounds = array<i64: 32, 32>}, {pipeline_mode = #tpu.pipeline_mode<synchronous>, transform_indices = @transform_8, window_bounds = array<i64: 1, 32>}, {pipeline_mode = #tpu.pipeline_mode<synchronous>, transform_indices = @transform_9, window_bounds = array<i64: 1, 32>}, {pipeline_mode = #tpu.pipeline_mode<synchronous>, transform_indices = @transform_10, window_bounds = array<i64: 1, 32>}, {pipeline_mode = #tpu.pipeline_mode<synchronous>, transform_indices = @transform_11, window_bounds = array<i64: 32, 32>}, {pipeline_mode = #tpu.pipeline_mode<synchronous>, transform_indices = @transform_12, window_bounds = array<i64: 1, 32>}, {pipeline_mode = #tpu.pipeline_mode<synchronous>, transform_indices = @transform_13, window_bounds = array<i64: 32, 128>}, {pipeline_mode = #tpu.pipeline_mode<synchronous>, transform_indices = @transform_14, window_bounds = array<i64: 1, 128>}, {pipeline_mode = #tpu.pipeline_mode<synchronous>, transform_indices = @transform_15, window_bounds = array<i64: 128, 32>}, {pipeline_mode = #tpu.pipeline_mode<synchronous>, transform_indices = @transform_16, window_bounds = array<i64: 1, 32>}, {transform_indices = @transform_17, window_bounds = array<i64: 1, 8, 32>}, {transform_indices = @transform_18, window_bounds = array<i64: 1, 4, 8, 8>}, {transform_indices = @transform_19, window_bounds = array<i64: 1, 4, 8, 8>}]} {
    %c8_i32 = arith.constant 8 : i32
    %0 = arith.muli %arg1, %c8_i32 : i32
    %1 = tpu.assume_multiple %0, 8 : i32
    %c0_i32 = arith.constant 0 : i32
    %2 = arith.cmpi eq, %arg1, %c0_i32 : i32
    %3 = arith.extui %2 : i1 to i32
    %c0_i32_0 = arith.constant 0 : i32
    %4 = arith.cmpi ne, %3, %c0_i32_0 : i32
    scf.if %4 {
      %c0_96 = arith.constant 0 : index
      %c0_97 = arith.constant 0 : index
      %c0_98 = arith.constant 0 : index
      %166 = vector.load %arg2[%c0_96, %c0_97, %c0_98] : memref<1x8x32xf32, #tpu.memory_space<vmem>>, vector<1x8x32xf32>
      %167 = vector.shape_cast %166 : vector<1x8x32xf32> to vector<8x32xf32>
      %c0_99 = arith.constant 0 : index
      %c0_100 = arith.constant 0 : index
      %168 = vector.load %arg3[%c0_99, %c0_100] : memref<1x32xf32, #tpu.memory_space<vmem>>, vector<1x32xf32>
      %c0_101 = arith.constant 0 : index
      %c0_102 = arith.constant 0 : index
      %169 = vector.load %arg4[%c0_101, %c0_102] : memref<1x32xf32, #tpu.memory_space<vmem>>, vector<1x32xf32>
      %cst_103 = arith.constant dense<0.000000e+00> : vector<8xf32>
      %170 = vector.multi_reduction <add>, %167, %cst_103 [1] : vector<8x32xf32> to vector<8xf32>
      %171 = vector.shape_cast %170 : vector<8xf32> to vector<8x1xf32>
      %cst_104 = arith.constant 3.200000e+01 : f32
      %172 = vector.broadcast %cst_104 : f32 to vector<8x1xf32>
      %173 = arith.divf %171, %172 : vector<8x1xf32>
      %174 = vector.broadcast %173 : vector<8x1xf32> to vector<8x32xf32>
      %175 = arith.subf %167, %174 : vector<8x32xf32>
      %176 = arith.mulf %175, %175 : vector<8x32xf32>
      %cst_105 = arith.constant dense<0.000000e+00> : vector<8xf32>
      %177 = vector.multi_reduction <add>, %176, %cst_105 [1] : vector<8x32xf32> to vector<8xf32>
      %178 = vector.shape_cast %177 : vector<8xf32> to vector<8x1xf32>
      %cst_106 = arith.constant 3.200000e+01 : f32
      %179 = vector.broadcast %cst_106 : f32 to vector<8x1xf32>
      %180 = arith.divf %178, %179 : vector<8x1xf32>
      %181 = vector.broadcast %173 : vector<8x1xf32> to vector<8x32xf32>
      %182 = arith.subf %167, %181 : vector<8x32xf32>
      %cst_107 = arith.constant 9.99999974E-6 : f32
      %183 = vector.broadcast %cst_107 : f32 to vector<8x1xf32>
      %184 = arith.addf %180, %183 : vector<8x1xf32>
      %185 = math.rsqrt %184 : vector<8x1xf32>
      %186 = vector.broadcast %185 : vector<8x1xf32> to vector<8x32xf32>
      %187 = arith.mulf %182, %186 : vector<8x32xf32>
      %188 = vector.broadcast %168 : vector<1x32xf32> to vector<8x32xf32>
      %189 = arith.mulf %187, %188 : vector<8x32xf32>
      %190 = vector.broadcast %169 : vector<1x32xf32> to vector<8x32xf32>
      %191 = arith.addf %189, %190 : vector<8x32xf32>
      %c0_108 = arith.constant 0 : index
      %c0_109 = arith.constant 0 : index
      %192 = vector.load %arg22[%c0_108, %c0_109] : memref<8x32xf32, #tpu.memory_space<vmem>>, vector<8x32xf32>
      tpu.vector_store %arg22[%c0_108, %c0_109], %191 {strides = array<i32>} : memref<8x32xf32, #tpu.memory_space<vmem>>, vector<8x32xf32>,
      %c0_110 = arith.constant 0 : index
      %c0_111 = arith.constant 0 : index
      %193 = vector.load %arg8[%c0_110, %c0_111] : memref<32x32xf32, #tpu.memory_space<vmem>>, vector<32x32xf32>
      %cst_112 = arith.constant dense<0.000000e+00> : vector<8x32xf32>
      %194 = tpu.matmul %191, %193, %cst_112 {dimension_numbers = #tpu.dot_dimension_numbers<[1], [0], [0], [1], [0, 0, 1, 1], [], []>} : vector<8x32xf32>, vector<32x32xf32>, vector<8x32xf32> -> vector<8x32xf32>
      %c0_113 = arith.constant 0 : index
      %c0_114 = arith.constant 0 : index
      %195 = vector.load %arg11[%c0_113, %c0_114] : memref<1x32xf32, #tpu.memory_space<vmem>>, vector<1x32xf32>
      %196 = vector.broadcast %195 : vector<1x32xf32> to vector<8x32xf32>
      %197 = arith.addf %194, %196 : vector<8x32xf32>
      %c0_115 = arith.constant 0 : index
      %c0_116 = arith.constant 0 : index
      %198 = vector.load %arg9[%c0_115, %c0_116] : memref<32x32xf32, #tpu.memory_space<vmem>>, vector<32x32xf32>
      %cst_117 = arith.constant dense<0.000000e+00> : vector<8x32xf32>
      %199 = tpu.matmul %191, %198, %cst_117 {dimension_numbers = #tpu.dot_dimension_numbers<[1], [0], [0], [1], [0, 0, 1, 1], [], []>} : vector<8x32xf32>, vector<32x32xf32>, vector<8x32xf32> -> vector<8x32xf32>
      %c0_118 = arith.constant 0 : index
      %c0_119 = arith.constant 0 : index
      %200 = vector.load %arg12[%c0_118, %c0_119] : memref<1x32xf32, #tpu.memory_space<vmem>>, vector<1x32xf32>
      %201 = vector.broadcast %200 : vector<1x32xf32> to vector<8x32xf32>
      %202 = arith.addf %199, %201 : vector<8x32xf32>
      %203 = vector.extract_strided_slice %197 {offsets = [0, 0], sizes = [8, 8], strides = [1, 1]} : vector<8x32xf32> to vector<8x8xf32>
      %c0_120 = arith.constant 0 : index
      %c0_121 = arith.constant 0 : index
      %c0_122 = arith.constant 0 : index
      %c0_123 = arith.constant 0 : index
      %204 = vector.load %arg20[%c0_120, %c0_121, %c0_122, %c0_123] : memref<1x4x8x8xf32, #tpu.memory_space<vmem>>, vector<1x1x8x8xf32>
      %205 = vector.shape_cast %204 : vector<1x1x8x8xf32> to vector<8x8xf32>
      %206 = vector.shape_cast %203 : vector<8x8xf32> to vector<1x1x8x8xf32>
      tpu.vector_store %arg20[%c0_120, %c0_121, %c0_122, %c0_123], %206 {strides = array<i32>} : memref<1x4x8x8xf32, #tpu.memory_space<vmem>>, vector<1x1x8x8xf32>,
      %207 = vector.extract_strided_slice %202 {offsets = [0, 0], sizes = [8, 8], strides = [1, 1]} : vector<8x32xf32> to vector<8x8xf32>
      %c0_124 = arith.constant 0 : index
      %c0_125 = arith.constant 0 : index
      %c0_126 = arith.constant 0 : index
      %c0_127 = arith.constant 0 : index
      %208 = vector.load %arg21[%c0_124, %c0_125, %c0_126, %c0_127] : memref<1x4x8x8xf32, #tpu.memory_space<vmem>>, vector<1x1x8x8xf32>
      %209 = vector.shape_cast %208 : vector<1x1x8x8xf32> to vector<8x8xf32>
      %210 = vector.shape_cast %207 : vector<8x8xf32> to vector<1x1x8x8xf32>
      tpu.vector_store %arg21[%c0_124, %c0_125, %c0_126, %c0_127], %210 {strides = array<i32>} : memref<1x4x8x8xf32, #tpu.memory_space<vmem>>, vector<1x1x8x8xf32>,
      %211 = vector.extract_strided_slice %197 {offsets = [0, 8], sizes = [8, 8], strides = [1, 1]} : vector<8x32xf32> to vector<8x8xf32>
      %c0_128 = arith.constant 0 : index
      %c1_129 = arith.constant 1 : index
      %c0_130 = arith.constant 0 : index
      %c0_131 = arith.constant 0 : index
      %212 = vector.load %arg20[%c0_128, %c1_129, %c0_130, %c0_131] : memref<1x4x8x8xf32, #tpu.memory_space<vmem>>, vector<1x1x8x8xf32>
      %213 = vector.shape_cast %212 : vector<1x1x8x8xf32> to vector<8x8xf32>
      %214 = vector.shape_cast %211 : vector<8x8xf32> to vector<1x1x8x8xf32>
      tpu.vector_store %arg20[%c0_128, %c1_129, %c0_130, %c0_131], %214 {strides = array<i32>} : memref<1x4x8x8xf32, #tpu.memory_space<vmem>>, vector<1x1x8x8xf32>,
      %215 = vector.extract_strided_slice %202 {offsets = [0, 8], sizes = [8, 8], strides = [1, 1]} : vector<8x32xf32> to vector<8x8xf32>
      %c0_132 = arith.constant 0 : index
      %c1_133 = arith.constant 1 : index
      %c0_134 = arith.constant 0 : index
      %c0_135 = arith.constant 0 : index
      %216 = vector.load %arg21[%c0_132, %c1_133, %c0_134, %c0_135] : memref<1x4x8x8xf32, #tpu.memory_space<vmem>>, vector<1x1x8x8xf32>
      %217 = vector.shape_cast %216 : vector<1x1x8x8xf32> to vector<8x8xf32>
      %218 = vector.shape_cast %215 : vector<8x8xf32> to vector<1x1x8x8xf32>
      tpu.vector_store %arg21[%c0_132, %c1_133, %c0_134, %c0_135], %218 {strides = array<i32>} : memref<1x4x8x8xf32, #tpu.memory_space<vmem>>, vector<1x1x8x8xf32>,
      %219 = vector.extract_strided_slice %197 {offsets = [0, 16], sizes = [8, 8], strides = [1, 1]} : vector<8x32xf32> to vector<8x8xf32>
      %c0_136 = arith.constant 0 : index
      %c2_137 = arith.constant 2 : index
      %c0_138 = arith.constant 0 : index
      %c0_139 = arith.constant 0 : index
      %220 = vector.load %arg20[%c0_136, %c2_137, %c0_138, %c0_139] : memref<1x4x8x8xf32, #tpu.memory_space<vmem>>, vector<1x1x8x8xf32>
      %221 = vector.shape_cast %220 : vector<1x1x8x8xf32> to vector<8x8xf32>
      %222 = vector.shape_cast %219 : vector<8x8xf32> to vector<1x1x8x8xf32>
      tpu.vector_store %arg20[%c0_136, %c2_137, %c0_138, %c0_139], %222 {strides = array<i32>} : memref<1x4x8x8xf32, #tpu.memory_space<vmem>>, vector<1x1x8x8xf32>,
      %223 = vector.extract_strided_slice %202 {offsets = [0, 16], sizes = [8, 8], strides = [1, 1]} : vector<8x32xf32> to vector<8x8xf32>
      %c0_140 = arith.constant 0 : index
      %c2_141 = arith.constant 2 : index
      %c0_142 = arith.constant 0 : index
      %c0_143 = arith.constant 0 : index
      %224 = vector.load %arg21[%c0_140, %c2_141, %c0_142, %c0_143] : memref<1x4x8x8xf32, #tpu.memory_space<vmem>>, vector<1x1x8x8xf32>
      %225 = vector.shape_cast %224 : vector<1x1x8x8xf32> to vector<8x8xf32>
      %226 = vector.shape_cast %223 : vector<8x8xf32> to vector<1x1x8x8xf32>
      tpu.vector_store %arg21[%c0_140, %c2_141, %c0_142, %c0_143], %226 {strides = array<i32>} : memref<1x4x8x8xf32, #tpu.memory_space<vmem>>, vector<1x1x8x8xf32>,
      %227 = vector.extract_strided_slice %197 {offsets = [0, 24], sizes = [8, 8], strides = [1, 1]} : vector<8x32xf32> to vector<8x8xf32>
      %c0_144 = arith.constant 0 : index
      %c3_145 = arith.constant 3 : index
      %c0_146 = arith.constant 0 : index
      %c0_147 = arith.constant 0 : index
      %228 = vector.load %arg20[%c0_144, %c3_145, %c0_146, %c0_147] : memref<1x4x8x8xf32, #tpu.memory_space<vmem>>, vector<1x1x8x8xf32>
      %229 = vector.shape_cast %228 : vector<1x1x8x8xf32> to vector<8x8xf32>
      %230 = vector.shape_cast %227 : vector<8x8xf32> to vector<1x1x8x8xf32>
      tpu.vector_store %arg20[%c0_144, %c3_145, %c0_146, %c0_147], %230 {strides = array<i32>} : memref<1x4x8x8xf32, #tpu.memory_space<vmem>>, vector<1x1x8x8xf32>,
      %231 = vector.extract_strided_slice %202 {offsets = [0, 24], sizes = [8, 8], strides = [1, 1]} : vector<8x32xf32> to vector<8x8xf32>
      %c0_148 = arith.constant 0 : index
      %c3_149 = arith.constant 3 : index
      %c0_150 = arith.constant 0 : index
      %c0_151 = arith.constant 0 : index
      %232 = vector.load %arg21[%c0_148, %c3_149, %c0_150, %c0_151] : memref<1x4x8x8xf32, #tpu.memory_space<vmem>>, vector<1x1x8x8xf32>
      %233 = vector.shape_cast %232 : vector<1x1x8x8xf32> to vector<8x8xf32>
      %234 = vector.shape_cast %231 : vector<8x8xf32> to vector<1x1x8x8xf32>
      tpu.vector_store %arg21[%c0_148, %c3_149, %c0_150, %c0_151], %234 {strides = array<i32>} : memref<1x4x8x8xf32, #tpu.memory_space<vmem>>, vector<1x1x8x8xf32>,
    } else {
    }
    %c0 = arith.constant 0 : index
    %5 = arith.index_cast %1 : i32 to index
    %c0_1 = arith.constant 0 : index
    %6 = vector.load %arg2[%c0, %5, %c0_1] : memref<1x8x32xf32, #tpu.memory_space<vmem>>, vector<1x8x32xf32>
    %7 = vector.shape_cast %6 : vector<1x8x32xf32> to vector<8x32xf32>
    %8 = arith.index_cast %1 : i32 to index
    %c0_2 = arith.constant 0 : index
    %9 = vector.load %arg22[%8, %c0_2] : memref<8x32xf32, #tpu.memory_space<vmem>>, vector<8x32xf32>
    %c0_3 = arith.constant 0 : index
    %c0_4 = arith.constant 0 : index
    %10 = vector.load %arg7[%c0_3, %c0_4] : memref<32x32xf32, #tpu.memory_space<vmem>>, vector<32x32xf32>
    %cst = arith.constant dense<0.000000e+00> : vector<8x32xf32>
    %11 = tpu.matmul %9, %10, %cst {dimension_numbers = #tpu.dot_dimension_numbers<[1], [0], [0], [1], [0, 0, 1, 1], [], []>} : vector<8x32xf32>, vector<32x32xf32>, vector<8x32xf32> -> vector<8x32xf32>
    %c0_5 = arith.constant 0 : index
    %c0_6 = arith.constant 0 : index
    %12 = vector.load %arg10[%c0_5, %c0_6] : memref<1x32xf32, #tpu.memory_space<vmem>>, vector<1x32xf32>
    %13 = vector.broadcast %12 : vector<1x32xf32> to vector<8x32xf32>
    %14 = arith.addf %11, %13 : vector<8x32xf32>
    %15 = tpu.iota {dimensions = array<i32: 0>} : vector<8x8xi32>
    %16 = vector.broadcast %1 : i32 to vector<8x8xi32>
    %17 = arith.addi %16, %15 : vector<8x8xi32>
    %18 = tpu.iota {dimensions = array<i32: 1>} : vector<8x8xi32>
    %19 = arith.cmpi sge, %17, %18 : vector<8x8xi32>
    %cst_7 = arith.constant 0.000000e+00 : f32
    %cst_8 = arith.constant -1.000000e+09 : f32
    %20 = vector.broadcast %cst_7 : f32 to vector<8x8xf32>
    %21 = vector.broadcast %cst_8 : f32 to vector<8x8xf32>
    %22 = arith.select %19, %20, %21 : vector<8x8xi1>, vector<8x8xf32>
    %23 = vector.extract_strided_slice %14 {offsets = [0, 0], sizes = [8, 8], strides = [1, 1]} : vector<8x32xf32> to vector<8x8xf32>
    %c0_9 = arith.constant 0 : index
    %c0_10 = arith.constant 0 : index
    %c0_11 = arith.constant 0 : index
    %c0_12 = arith.constant 0 : index
    %24 = vector.load %arg20[%c0_9, %c0_10, %c0_11, %c0_12] : memref<1x4x8x8xf32, #tpu.memory_space<vmem>>, vector<1x1x8x8xf32>
    %25 = vector.shape_cast %24 : vector<1x1x8x8xf32> to vector<8x8xf32>
    %c0_13 = arith.constant 0 : index
    %c0_14 = arith.constant 0 : index
    %c0_15 = arith.constant 0 : index
    %c0_16 = arith.constant 0 : index
    %26 = vector.load %arg21[%c0_13, %c0_14, %c0_15, %c0_16] : memref<1x4x8x8xf32, #tpu.memory_space<vmem>>, vector<1x1x8x8xf32>
    %27 = vector.shape_cast %26 : vector<1x1x8x8xf32> to vector<8x8xf32>
    "tpu.trace_start"() <{level = 10 : i32, message = "qd,kd->qk"}> : () -> ()
    %cst_17 = arith.constant dense<0.000000e+00> : vector<8x8xf32>
    %28 = tpu.matmul %23, %25, %cst_17 {dimension_numbers = #tpu.dot_dimension_numbers<[1], [1], [0], [0], [0, 0, 1, 0], [], []>} : vector<8x8xf32>, vector<8x8xf32>, vector<8x8xf32> -> vector<8x8xf32>
    "tpu.trace_stop"() : () -> ()
    %cst_18 = arith.constant 0.353553385 : f32
    %29 = vector.broadcast %cst_18 : f32 to vector<8x8xf32>
    %30 = arith.mulf %28, %29 : vector<8x8xf32>
    %31 = arith.addf %30, %22 : vector<8x8xf32>
    %cst_19 = arith.constant dense<0xFF800000> : vector<8xf32>
    %32 = vector.multi_reduction <maximumf>, %31, %cst_19 [1] : vector<8x8xf32> to vector<8xf32>
    %33 = vector.shape_cast %32 : vector<8xf32> to vector<8x1xf32>
    %34 = vector.broadcast %33 : vector<8x1xf32> to vector<8x8xf32>
    %35 = arith.subf %31, %34 : vector<8x8xf32>
    %36 = math.exp %35 : vector<8x8xf32>
    %cst_20 = arith.constant dense<0.000000e+00> : vector<8xf32>
    %37 = vector.multi_reduction <add>, %36, %cst_20 [1] : vector<8x8xf32> to vector<8xf32>
    %38 = vector.shape_cast %37 : vector<8xf32> to vector<8x1xf32>
    %cst_21 = arith.constant dense<0.000000e+00> : vector<8x8xf32>
    %39 = tpu.matmul %36, %27, %cst_21 {dimension_numbers = #tpu.dot_dimension_numbers<[1], [0], [0], [1], [0, 0, 1, 1], [], []>} : vector<8x8xf32>, vector<8x8xf32>, vector<8x8xf32> -> vector<8x8xf32>
    %40 = tpu.reciprocal %38 {approx = true} : vector<8x1xf32> -> vector<8x1xf32>
    %41 = vector.broadcast %40 : vector<8x1xf32> to vector<8x8xf32>
    %42 = arith.mulf %39, %41 : vector<8x8xf32>
    %c0_22 = arith.constant 0 : index
    %c0_23 = arith.constant 0 : index
    %43 = vector.load %arg23[%c0_22, %c0_23] : memref<8x32xf32, #tpu.memory_space<vmem>>, vector<8x8xf32>
    tpu.vector_store %arg23[%c0_22, %c0_23], %42 {strides = array<i32>} : memref<8x32xf32, #tpu.memory_space<vmem>>, vector<8x8xf32>,
    %44 = vector.extract_strided_slice %14 {offsets = [0, 8], sizes = [8, 8], strides = [1, 1]} : vector<8x32xf32> to vector<8x8xf32>
    %c0_24 = arith.constant 0 : index
    %c1 = arith.constant 1 : index
    %c0_25 = arith.constant 0 : index
    %c0_26 = arith.constant 0 : index
    %45 = vector.load %arg20[%c0_24, %c1, %c0_25, %c0_26] : memref<1x4x8x8xf32, #tpu.memory_space<vmem>>, vector<1x1x8x8xf32>
    %46 = vector.shape_cast %45 : vector<1x1x8x8xf32> to vector<8x8xf32>
    %c0_27 = arith.constant 0 : index
    %c1_28 = arith.constant 1 : index
    %c0_29 = arith.constant 0 : index
    %c0_30 = arith.constant 0 : index
    %47 = vector.load %arg21[%c0_27, %c1_28, %c0_29, %c0_30] : memref<1x4x8x8xf32, #tpu.memory_space<vmem>>, vector<1x1x8x8xf32>
    %48 = vector.shape_cast %47 : vector<1x1x8x8xf32> to vector<8x8xf32>
    "tpu.trace_start"() <{level = 10 : i32, message = "qd,kd->qk"}> : () -> ()
    %cst_31 = arith.constant dense<0.000000e+00> : vector<8x8xf32>
    %49 = tpu.matmul %44, %46, %cst_31 {dimension_numbers = #tpu.dot_dimension_numbers<[1], [1], [0], [0], [0, 0, 1, 0], [], []>} : vector<8x8xf32>, vector<8x8xf32>, vector<8x8xf32> -> vector<8x8xf32>
    "tpu.trace_stop"() : () -> ()
    %cst_32 = arith.constant 0.353553385 : f32
    %50 = vector.broadcast %cst_32 : f32 to vector<8x8xf32>
    %51 = arith.mulf %49, %50 : vector<8x8xf32>
    %52 = arith.addf %51, %22 : vector<8x8xf32>
    %cst_33 = arith.constant dense<0xFF800000> : vector<8xf32>
    %53 = vector.multi_reduction <maximumf>, %52, %cst_33 [1] : vector<8x8xf32> to vector<8xf32>
    %54 = vector.shape_cast %53 : vector<8xf32> to vector<8x1xf32>
    %55 = vector.broadcast %54 : vector<8x1xf32> to vector<8x8xf32>
    %56 = arith.subf %52, %55 : vector<8x8xf32>
    %57 = math.exp %56 : vector<8x8xf32>
    %cst_34 = arith.constant dense<0.000000e+00> : vector<8xf32>
    %58 = vector.multi_reduction <add>, %57, %cst_34 [1] : vector<8x8xf32> to vector<8xf32>
    %59 = vector.shape_cast %58 : vector<8xf32> to vector<8x1xf32>
    %cst_35 = arith.constant dense<0.000000e+00> : vector<8x8xf32>
    %60 = tpu.matmul %57, %48, %cst_35 {dimension_numbers = #tpu.dot_dimension_numbers<[1], [0], [0], [1], [0, 0, 1, 1], [], []>} : vector<8x8xf32>, vector<8x8xf32>, vector<8x8xf32> -> vector<8x8xf32>
    %61 = tpu.reciprocal %59 {approx = true} : vector<8x1xf32> -> vector<8x1xf32>
    %62 = vector.broadcast %61 : vector<8x1xf32> to vector<8x8xf32>
    %63 = arith.mulf %60, %62 : vector<8x8xf32>
    %c0_36 = arith.constant 0 : index
    %c8 = arith.constant 8 : index
    %64 = vector.load %arg23[%c0_36, %c8] : memref<8x32xf32, #tpu.memory_space<vmem>>, vector<8x8xf32>
    tpu.vector_store %arg23[%c0_36, %c8], %63 {strides = array<i32>} : memref<8x32xf32, #tpu.memory_space<vmem>>, vector<8x8xf32>,
    %65 = vector.extract_strided_slice %14 {offsets = [0, 16], sizes = [8, 8], strides = [1, 1]} : vector<8x32xf32> to vector<8x8xf32>
    %c0_37 = arith.constant 0 : index
    %c2 = arith.constant 2 : index
    %c0_38 = arith.constant 0 : index
    %c0_39 = arith.constant 0 : index
    %66 = vector.load %arg20[%c0_37, %c2, %c0_38, %c0_39] : memref<1x4x8x8xf32, #tpu.memory_space<vmem>>, vector<1x1x8x8xf32>
    %67 = vector.shape_cast %66 : vector<1x1x8x8xf32> to vector<8x8xf32>
    %c0_40 = arith.constant 0 : index
    %c2_41 = arith.constant 2 : index
    %c0_42 = arith.constant 0 : index
    %c0_43 = arith.constant 0 : index
    %68 = vector.load %arg21[%c0_40, %c2_41, %c0_42, %c0_43] : memref<1x4x8x8xf32, #tpu.memory_space<vmem>>, vector<1x1x8x8xf32>
    %69 = vector.shape_cast %68 : vector<1x1x8x8xf32> to vector<8x8xf32>
    "tpu.trace_start"() <{level = 10 : i32, message = "qd,kd->qk"}> : () -> ()
    %cst_44 = arith.constant dense<0.000000e+00> : vector<8x8xf32>
    %70 = tpu.matmul %65, %67, %cst_44 {dimension_numbers = #tpu.dot_dimension_numbers<[1], [1], [0], [0], [0, 0, 1, 0], [], []>} : vector<8x8xf32>, vector<8x8xf32>, vector<8x8xf32> -> vector<8x8xf32>
    "tpu.trace_stop"() : () -> ()
    %cst_45 = arith.constant 0.353553385 : f32
    %71 = vector.broadcast %cst_45 : f32 to vector<8x8xf32>
    %72 = arith.mulf %70, %71 : vector<8x8xf32>
    %73 = arith.addf %72, %22 : vector<8x8xf32>
    %cst_46 = arith.constant dense<0xFF800000> : vector<8xf32>
    %74 = vector.multi_reduction <maximumf>, %73, %cst_46 [1] : vector<8x8xf32> to vector<8xf32>
    %75 = vector.shape_cast %74 : vector<8xf32> to vector<8x1xf32>
    %76 = vector.broadcast %75 : vector<8x1xf32> to vector<8x8xf32>
    %77 = arith.subf %73, %76 : vector<8x8xf32>
    %78 = math.exp %77 : vector<8x8xf32>
    %cst_47 = arith.constant dense<0.000000e+00> : vector<8xf32>
    %79 = vector.multi_reduction <add>, %78, %cst_47 [1] : vector<8x8xf32> to vector<8xf32>
    %80 = vector.shape_cast %79 : vector<8xf32> to vector<8x1xf32>
    %cst_48 = arith.constant dense<0.000000e+00> : vector<8x8xf32>
    %81 = tpu.matmul %78, %69, %cst_48 {dimension_numbers = #tpu.dot_dimension_numbers<[1], [0], [0], [1], [0, 0, 1, 1], [], []>} : vector<8x8xf32>, vector<8x8xf32>, vector<8x8xf32> -> vector<8x8xf32>
    %82 = tpu.reciprocal %80 {approx = true} : vector<8x1xf32> -> vector<8x1xf32>
    %83 = vector.broadcast %82 : vector<8x1xf32> to vector<8x8xf32>
    %84 = arith.mulf %81, %83 : vector<8x8xf32>
    %c0_49 = arith.constant 0 : index
    %c16 = arith.constant 16 : index
    %85 = vector.load %arg23[%c0_49, %c16] : memref<8x32xf32, #tpu.memory_space<vmem>>, vector<8x8xf32>
    tpu.vector_store %arg23[%c0_49, %c16], %84 {strides = array<i32>} : memref<8x32xf32, #tpu.memory_space<vmem>>, vector<8x8xf32>,
    %86 = vector.extract_strided_slice %14 {offsets = [0, 24], sizes = [8, 8], strides = [1, 1]} : vector<8x32xf32> to vector<8x8xf32>
    %c0_50 = arith.constant 0 : index
    %c3 = arith.constant 3 : index
    %c0_51 = arith.constant 0 : index
    %c0_52 = arith.constant 0 : index
    %87 = vector.load %arg20[%c0_50, %c3, %c0_51, %c0_52] : memref<1x4x8x8xf32, #tpu.memory_space<vmem>>, vector<1x1x8x8xf32>
    %88 = vector.shape_cast %87 : vector<1x1x8x8xf32> to vector<8x8xf32>
    %c0_53 = arith.constant 0 : index
    %c3_54 = arith.constant 3 : index
    %c0_55 = arith.constant 0 : index
    %c0_56 = arith.constant 0 : index
    %89 = vector.load %arg21[%c0_53, %c3_54, %c0_55, %c0_56] : memref<1x4x8x8xf32, #tpu.memory_space<vmem>>, vector<1x1x8x8xf32>
    %90 = vector.shape_cast %89 : vector<1x1x8x8xf32> to vector<8x8xf32>
    "tpu.trace_start"() <{level = 10 : i32, message = "qd,kd->qk"}> : () -> ()
    %cst_57 = arith.constant dense<0.000000e+00> : vector<8x8xf32>
    %91 = tpu.matmul %86, %88, %cst_57 {dimension_numbers = #tpu.dot_dimension_numbers<[1], [1], [0], [0], [0, 0, 1, 0], [], []>} : vector<8x8xf32>, vector<8x8xf32>, vector<8x8xf32> -> vector<8x8xf32>
    "tpu.trace_stop"() : () -> ()
    %cst_58 = arith.constant 0.353553385 : f32
    %92 = vector.broadcast %cst_58 : f32 to vector<8x8xf32>
    %93 = arith.mulf %91, %92 : vector<8x8xf32>
    %94 = arith.addf %93, %22 : vector<8x8xf32>
    %cst_59 = arith.constant dense<0xFF800000> : vector<8xf32>
    %95 = vector.multi_reduction <maximumf>, %94, %cst_59 [1] : vector<8x8xf32> to vector<8xf32>
    %96 = vector.shape_cast %95 : vector<8xf32> to vector<8x1xf32>
    %97 = vector.broadcast %96 : vector<8x1xf32> to vector<8x8xf32>
    %98 = arith.subf %94, %97 : vector<8x8xf32>
    %99 = math.exp %98 : vector<8x8xf32>
    %cst_60 = arith.constant dense<0.000000e+00> : vector<8xf32>
    %100 = vector.multi_reduction <add>, %99, %cst_60 [1] : vector<8x8xf32> to vector<8xf32>
    %101 = vector.shape_cast %100 : vector<8xf32> to vector<8x1xf32>
    %cst_61 = arith.constant dense<0.000000e+00> : vector<8x8xf32>
    %102 = tpu.matmul %99, %90, %cst_61 {dimension_numbers = #tpu.dot_dimension_numbers<[1], [0], [0], [1], [0, 0, 1, 1], [], []>} : vector<8x8xf32>, vector<8x8xf32>, vector<8x8xf32> -> vector<8x8xf32>
    %103 = tpu.reciprocal %101 {approx = true} : vector<8x1xf32> -> vector<8x1xf32>
    %104 = vector.broadcast %103 : vector<8x1xf32> to vector<8x8xf32>
    %105 = arith.mulf %102, %104 : vector<8x8xf32>
    %c0_62 = arith.constant 0 : index
    %c24 = arith.constant 24 : index
    %106 = vector.load %arg23[%c0_62, %c24] : memref<8x32xf32, #tpu.memory_space<vmem>>, vector<8x8xf32>
    tpu.vector_store %arg23[%c0_62, %c24], %105 {strides = array<i32>} : memref<8x32xf32, #tpu.memory_space<vmem>>, vector<8x8xf32>,
    %c0_63 = arith.constant 0 : index
    %c0_64 = arith.constant 0 : index
    %107 = vector.load %arg23[%c0_63, %c0_64] : memref<8x32xf32, #tpu.memory_space<vmem>>, vector<8x32xf32>
    %c0_65 = arith.constant 0 : index
    %c0_66 = arith.constant 0 : index
    %108 = vector.load %arg13[%c0_65, %c0_66] : memref<32x32xf32, #tpu.memory_space<vmem>>, vector<32x32xf32>
    %cst_67 = arith.constant dense<0.000000e+00> : vector<8x32xf32>
    %109 = tpu.matmul %107, %108, %cst_67 {dimension_numbers = #tpu.dot_dimension_numbers<[1], [0], [0], [1], [0, 0, 1, 1], [], []>} : vector<8x32xf32>, vector<32x32xf32>, vector<8x32xf32> -> vector<8x32xf32>
    %c0_68 = arith.constant 0 : index
    %c0_69 = arith.constant 0 : index
    %110 = vector.load %arg14[%c0_68, %c0_69] : memref<1x32xf32, #tpu.memory_space<vmem>>, vector<1x32xf32>
    %111 = vector.broadcast %110 : vector<1x32xf32> to vector<8x32xf32>
    %112 = arith.addf %109, %111 : vector<8x32xf32>
    %113 = arith.addf %112, %7 : vector<8x32xf32>
    %c0_70 = arith.constant 0 : index
    %c0_71 = arith.constant 0 : index
    %114 = vector.load %arg5[%c0_70, %c0_71] : memref<1x32xf32, #tpu.memory_space<vmem>>, vector<1x32xf32>
    %c0_72 = arith.constant 0 : index
    %c0_73 = arith.constant 0 : index
    %115 = vector.load %arg6[%c0_72, %c0_73] : memref<1x32xf32, #tpu.memory_space<vmem>>, vector<1x32xf32>
    %cst_74 = arith.constant dense<0.000000e+00> : vector<8xf32>
    %116 = vector.multi_reduction <add>, %113, %cst_74 [1] : vector<8x32xf32> to vector<8xf32>
    %117 = vector.shape_cast %116 : vector<8xf32> to vector<8x1xf32>
    %cst_75 = arith.constant 3.200000e+01 : f32
    %118 = vector.broadcast %cst_75 : f32 to vector<8x1xf32>
    %119 = arith.divf %117, %118 : vector<8x1xf32>
    %120 = vector.broadcast %119 : vector<8x1xf32> to vector<8x32xf32>
    %121 = arith.subf %113, %120 : vector<8x32xf32>
    %122 = arith.mulf %121, %121 : vector<8x32xf32>
    %cst_76 = arith.constant dense<0.000000e+00> : vector<8xf32>
    %123 = vector.multi_reduction <add>, %122, %cst_76 [1] : vector<8x32xf32> to vector<8xf32>
    %124 = vector.shape_cast %123 : vector<8xf32> to vector<8x1xf32>
    %cst_77 = arith.constant 3.200000e+01 : f32
    %125 = vector.broadcast %cst_77 : f32 to vector<8x1xf32>
    %126 = arith.divf %124, %125 : vector<8x1xf32>
    %127 = vector.broadcast %119 : vector<8x1xf32> to vector<8x32xf32>
    %128 = arith.subf %113, %127 : vector<8x32xf32>
    %cst_78 = arith.constant 9.99999974E-6 : f32
    %129 = vector.broadcast %cst_78 : f32 to vector<8x1xf32>
    %130 = arith.addf %126, %129 : vector<8x1xf32>
    %131 = math.rsqrt %130 : vector<8x1xf32>
    %132 = vector.broadcast %131 : vector<8x1xf32> to vector<8x32xf32>
    %133 = arith.mulf %128, %132 : vector<8x32xf32>
    %134 = vector.broadcast %114 : vector<1x32xf32> to vector<8x32xf32>
    %135 = arith.mulf %133, %134 : vector<8x32xf32>
    %136 = vector.broadcast %115 : vector<1x32xf32> to vector<8x32xf32>
    %137 = arith.addf %135, %136 : vector<8x32xf32>
    %c0_79 = arith.constant 0 : index
    %c0_80 = arith.constant 0 : index
    %138 = vector.load %arg15[%c0_79, %c0_80] : memref<32x128xf32, #tpu.memory_space<vmem>>, vector<32x128xf32>
    %cst_81 = arith.constant dense<0.000000e+00> : vector<8x128xf32>
    %139 = tpu.matmul %137, %138, %cst_81 {dimension_numbers = #tpu.dot_dimension_numbers<[1], [0], [0], [1], [0, 0, 1, 1], [], []>} : vector<8x32xf32>, vector<32x128xf32>, vector<8x128xf32> -> vector<8x128xf32>
    %c0_82 = arith.constant 0 : index
    %c0_83 = arith.constant 0 : index
    %140 = vector.load %arg16[%c0_82, %c0_83] : memref<1x128xf32, #tpu.memory_space<vmem>>, vector<1x128xf32>
    %141 = vector.broadcast %140 : vector<1x128xf32> to vector<8x128xf32>
    %142 = arith.addf %139, %141 : vector<8x128xf32>
    %cst_84 = arith.constant 5.000000e-01 : f32
    %143 = vector.broadcast %cst_84 : f32 to vector<8x128xf32>
    %144 = arith.mulf %143, %142 : vector<8x128xf32>
    %cst_85 = arith.constant 4.471500e-02 : f32
    %145 = vector.broadcast %cst_85 : f32 to vector<8x128xf32>
    %146 = arith.mulf %145, %142 : vector<8x128xf32>
    %147 = arith.mulf %146, %142 : vector<8x128xf32>
    %148 = arith.mulf %147, %142 : vector<8x128xf32>
    %149 = arith.addf %142, %148 : vector<8x128xf32>
    %cst_86 = arith.constant 0.797884583 : f32
    %150 = vector.broadcast %cst_86 : f32 to vector<8x128xf32>
    %151 = arith.mulf %150, %149 : vector<8x128xf32>
    %152 = math.tanh %151 : vector<8x128xf32>
    %cst_87 = arith.constant 1.000000e+00 : f32
    %153 = vector.broadcast %cst_87 : f32 to vector<8x128xf32>
    %154 = arith.addf %153, %152 : vector<8x128xf32>
    %155 = arith.mulf %144, %154 : vector<8x128xf32>
    %c0_88 = arith.constant 0 : index
    %c0_89 = arith.constant 0 : index
    %156 = vector.load %arg17[%c0_88, %c0_89] : memref<128x32xf32, #tpu.memory_space<vmem>>, vector<128x32xf32>
    %cst_90 = arith.constant dense<0.000000e+00> : vector<8x32xf32>
    %157 = tpu.matmul %155, %156, %cst_90 {dimension_numbers = #tpu.dot_dimension_numbers<[1], [0], [0], [1], [0, 0, 1, 1], [], []>} : vector<8x128xf32>, vector<128x32xf32>, vector<8x32xf32> -> vector<8x32xf32>
    %c0_91 = arith.constant 0 : index
    %c0_92 = arith.constant 0 : index
    %158 = vector.load %arg18[%c0_91, %c0_92] : memref<1x32xf32, #tpu.memory_space<vmem>>, vector<1x32xf32>
    %159 = vector.broadcast %158 : vector<1x32xf32> to vector<8x32xf32>
    %160 = arith.addf %157, %159 : vector<8x32xf32>
    %161 = arith.addf %7, %112 : vector<8x32xf32>
    %162 = arith.addf %161, %160 : vector<8x32xf32>
    %c0_93 = arith.constant 0 : index
    %c0_94 = arith.constant 0 : index
    %c0_95 = arith.constant 0 : index
    %163 = vector.load %arg19[%c0_93, %c0_94, %c0_95] : memref<1x8x32xf32, #tpu.memory_space<vmem>>, vector<1x8x32xf32>
    %164 = vector.shape_cast %163 : vector<1x8x32xf32> to vector<8x32xf32>
    %165 = vector.shape_cast %162 : vector<8x32xf32> to vector<1x8x32xf32>
    tpu.vector_store %arg19[%c0_93, %c0_94, %c0_95], %165 {strides = array<i32>} : memref<1x8x32xf32, #tpu.memory_space<vmem>>, vector<1x8x32xf32>,
    return
  }
  func.func @transform_0(%arg0: i32, %arg1: i32) -> (i32, i32, i32) {
    %c0_i32 = arith.constant 0 : i32
    %c0_i32_0 = arith.constant 0 : i32
    %c0_i32_1 = arith.constant 0 : i32
    return %arg0, %c0_i32, %c0_i32_0 : i32, i32, i32
  }
  func.func @transform_1(%arg0: i32, %arg1: i32) -> (i32, i32) {
    %c0_i32 = arith.constant 0 : i32
    %c0_i32_0 = arith.constant 0 : i32
    %c0_i32_1 = arith.constant 0 : i32
    return %c0_i32, %c0_i32_0 : i32, i32
  }
  func.func @transform_2(%arg0: i32, %arg1: i32) -> (i32, i32) {
    %c0_i32 = arith.constant 0 : i32
    %c0_i32_0 = arith.constant 0 : i32
    %c0_i32_1 = arith.constant 0 : i32
    return %c0_i32, %c0_i32_0 : i32, i32
  }
  func.func @transform_3(%arg0: i32, %arg1: i32) -> (i32, i32) {
    %c0_i32 = arith.constant 0 : i32
    %c0_i32_0 = arith.constant 0 : i32
    %c0_i32_1 = arith.constant 0 : i32
    return %c0_i32, %c0_i32_0 : i32, i32
  }
  func.func @transform_4(%arg0: i32, %arg1: i32) -> (i32, i32) {
    %c0_i32 = arith.constant 0 : i32
    %c0_i32_0 = arith.constant 0 : i32
    %c0_i32_1 = arith.constant 0 : i32
    return %c0_i32, %c0_i32_0 : i32, i32
  }
  func.func @transform_5(%arg0: i32, %arg1: i32) -> (i32, i32) {
    %c0_i32 = arith.constant 0 : i32
    %c0_i32_0 = arith.constant 0 : i32
    %c0_i32_1 = arith.constant 0 : i32
    return %c0_i32, %c0_i32_0 : i32, i32
  }
  func.func @transform_6(%arg0: i32, %arg1: i32) -> (i32, i32) {
    %c0_i32 = arith.constant 0 : i32
    %c0_i32_0 = arith.constant 0 : i32
    %c0_i32_1 = arith.constant 0 : i32
    return %c0_i32, %c0_i32_0 : i32, i32
  }
  func.func @transform_7(%arg0: i32, %arg1: i32) -> (i32, i32) {
    %c0_i32 = arith.constant 0 : i32
    %c0_i32_0 = arith.constant 0 : i32
    %c0_i32_1 = arith.constant 0 : i32
    return %c0_i32, %c0_i32_0 : i32, i32
  }
  func.func @transform_8(%arg0: i32, %arg1: i32) -> (i32, i32) {
    %c0_i32 = arith.constant 0 : i32
    %c0_i32_0 = arith.constant 0 : i32
    %c0_i32_1 = arith.constant 0 : i32
    return %c0_i32, %c0_i32_0 : i32, i32
  }
  func.func @transform_9(%arg0: i32, %arg1: i32) -> (i32, i32) {
    %c0_i32 = arith.constant 0 : i32
    %c0_i32_0 = arith.constant 0 : i32
    %c0_i32_1 = arith.constant 0 : i32
    return %c0_i32, %c0_i32_0 : i32, i32
  }
  func.func @transform_10(%arg0: i32, %arg1: i32) -> (i32, i32) {
    %c0_i32 = arith.constant 0 : i32
    %c0_i32_0 = arith.constant 0 : i32
    %c0_i32_1 = arith.constant 0 : i32
    return %c0_i32, %c0_i32_0 : i32, i32
  }
  func.func @transform_11(%arg0: i32, %arg1: i32) -> (i32, i32) {
    %c0_i32 = arith.constant 0 : i32
    %c0_i32_0 = arith.constant 0 : i32
    %c0_i32_1 = arith.constant 0 : i32
    return %c0_i32, %c0_i32_0 : i32, i32
  }
  func.func @transform_12(%arg0: i32, %arg1: i32) -> (i32, i32) {
    %c0_i32 = arith.constant 0 : i32
    %c0_i32_0 = arith.constant 0 : i32
    %c0_i32_1 = arith.constant 0 : i32
    return %c0_i32, %c0_i32_0 : i32, i32
  }
  func.func @transform_13(%arg0: i32, %arg1: i32) -> (i32, i32) {
    %c0_i32 = arith.constant 0 : i32
    %c0_i32_0 = arith.constant 0 : i32
    %c0_i32_1 = arith.constant 0 : i32
    return %c0_i32, %c0_i32_0 : i32, i32
  }
  func.func @transform_14(%arg0: i32, %arg1: i32) -> (i32, i32) {
    %c0_i32 = arith.constant 0 : i32
    %c0_i32_0 = arith.constant 0 : i32
    %c0_i32_1 = arith.constant 0 : i32
    return %c0_i32, %c0_i32_0 : i32, i32
  }
  func.func @transform_15(%arg0: i32, %arg1: i32) -> (i32, i32) {
    %c0_i32 = arith.constant 0 : i32
    %c0_i32_0 = arith.constant 0 : i32
    %c0_i32_1 = arith.constant 0 : i32
    return %c0_i32, %c0_i32_0 : i32, i32
  }
  func.func @transform_16(%arg0: i32, %arg1: i32) -> (i32, i32) {
    %c0_i32 = arith.constant 0 : i32
    %c0_i32_0 = arith.constant 0 : i32
    %c0_i32_1 = arith.constant 0 : i32
    return %c0_i32, %c0_i32_0 : i32, i32
  }
  func.func @transform_17(%arg0: i32, %arg1: i32) -> (i32, i32, i32) {
    %c0_i32 = arith.constant 0 : i32
    %c0_i32_0 = arith.constant 0 : i32
    return %arg0, %arg1, %c0_i32 : i32, i32, i32
  }
  func.func @transform_18(%arg0: i32, %arg1: i32) -> (i32, i32, i32, i32) {
    %c0_i32 = arith.constant 0 : i32
    %c0_i32_0 = arith.constant 0 : i32
    %c0_i32_1 = arith.constant 0 : i32
    %c0_i32_2 = arith.constant 0 : i32
    return %arg0, %c0_i32, %c0_i32_0, %c0_i32_1 : i32, i32, i32, i32
  }
  func.func @transform_19(%arg0: i32, %arg1: i32) -> (i32, i32, i32, i32) {
    %c0_i32 = arith.constant 0 : i32
    %c0_i32_0 = arith.constant 0 : i32
    %c0_i32_1 = arith.constant 0 : i32
    %c0_i32_2 = arith.constant 0 : i32
    return %arg0, %c0_i32, %c0_i32_0, %c0_i32_1 : i32, i32, i32, i32
  }
}

</mosaic_0001>

<bundles_post_ra>
// kernel: tpu_custom_call.1
= control target key start
LH: loop header
LB: loop body
LE: loop exit
PB: predicated region body
PF: predicated region fallthrough
CT: control target
= control target key end

     0   :  { %s3318_s0 = inlined_call_operand.hbm [shape: f32[2,8,32], index: 0, kind: input, shape index: {}]   ;;  %s3319_s1 = inlined_call_operand.vmem [shape: f32[1,32], index: 1, kind: input, shape index: {}]   ;;  %s3320_s2 = inlined_call_operand.vmem [shape: f32[1,32], index: 2, kind: input, shape index: {}]   ;;  %s3321_s3 = inlined_call_operand.vmem [shape: f32[1,32], index: 3, kind: input, shape index: {}]   ;;  %s3322_s4 = inlined_call_operand.vmem [shape: f32[1,32], index: 4, kind: input, shape index: {}]   ;;  %s3323_s5 = inlined_call_operand.vmem [shape: f32[32,32], index: 5, kind: input, shape index: {}]   ;;  %s3324_s6 = inlined_call_operand.vmem [shape: f32[32,32], index: 6, kind: input, shape index: {}]   ;;  %s3325_s7 = inlined_call_operand.vmem [shape: f32[32,32], index: 7, kind: input, shape index: {}]   ;;  %s3326_s8 = inlined_call_operand.vmem [shape: f32[1,32], index: 8, kind: input, shape index: {}]   ;;  %s3327_s9 = inlined_call_operand.vmem [shape: f32[1,32], index: 9, kind: input, shape index: {}]   ;;  %s3328_s10 = inlined_call_operand.vmem [shape: f32[1,32], index: 10, kind: input, shape index: {}]   ;;  %s3329_s11 = inlined_call_operand.vmem [shape: f32[32,32], index: 11, kind: input, shape index: {}]   ;;  %s3330_s12 = inlined_call_operand.vmem [shape: f32[1,32], index: 12, kind: input, shape index: {}]   ;;  %s3331_s13 = inlined_call_operand.vmem [shape: f32[32,128], index: 13, kind: input, shape index: {}]   ;;  %s3332_s14 = inlined_call_operand.vmem [shape: f32[1,128], index: 14, kind: input, shape index: {}]   ;;  %s3333_s15 = inlined_call_operand.vmem [shape: f32[128,32], index: 15, kind: input, shape index: {}]   ;;  %s3334_s16 = inlined_call_operand.vmem [shape: f32[1,32], index: 16, kind: input, shape index: {}]   ;;  %s3335_s17 = inlined_call_operand.hbm [shape: f32[2,8,32], index: 17, kind: output, shape index: {0}]   ;;  %s3336_s18 = inlined_call_operand.hbm [shape: f32[2,4,8,8], index: 18, kind: output, shape index: {1}]   ;;  %s3337_s19 = inlined_call_operand.hbm [shape: f32[2,4,8,8], index: 19, kind: output, shape index: {2}]  }
   0x1   :  { %3350 = sst [smem:[#allocation19_spill]] %s3318_s0 }
   0x2   :  { %3351 = sst [smem:[#allocation20_spill]] %s3319_s1 }
   0x3   :  { %3352 = sst [smem:[#allocation21_spill]] %s3320_s2 }
   0x4   :  { %3353 = sst [smem:[#allocation22_spill]] %s3321_s3 }
   0x5   :  { %3354 = sst [smem:[#allocation23_spill]] %s3322_s4 }
   0x6   :  { %3355 = sst [smem:[#allocation24_spill]] %s3323_s5 }
   0x7   :  { %3356 = sst [smem:[#allocation25_spill]] %s3324_s6 }
   0x8   :  { %3357 = sst [smem:[#allocation26_spill]] %s3325_s7 }
   0x9   :  { %3358 = sst [smem:[#allocation27_spill]] %s3326_s8 }
   0xa   :  { %3359 = sst [smem:[#allocation28_spill]] %s3327_s9 }
   0xb   :  { %3360 = sst [smem:[#allocation29_spill]] %s3332_s14 }
   0xc   :  { %3361 = sst [smem:[#allocation30_spill]] %s3334_s16 }
   0xd   :  { %3362 = sst [smem:[#allocation31_spill]] %s3335_s17 }
   0xe   :  { %3363 = sst [smem:[#allocation32_spill]] %s3336_s18 }
   0xf   :  { %3364 = sst [smem:[#allocation33_spill]] %s3337_s19 }
  0x10   :  { %25 = vsyncpa [#allocation5], 0 }
  0x11   :  { %27 = vsyncpa [#allocation5 + $0x1], 0 }
  0x12   :  { %28 = vsyncpa [#allocation6], 0 }
  0x13   :  { %30 = vsyncpa [#allocation6 + $0x1], 0 }
  0x14   :  { %31 = vsyncpa [#allocation9], 0 }
  0x15   :  { %33 = vsyncpa [#allocation9 + $0x1], 0  ;;  %s2809_s0 = smov 0   ;;  %s2811_s30 = smov 0  }
  0x16   :  { %s2813_s20 = smov 0   ;;  %s2815_s21 = smov 0  }
  0x17   :  { %s2817_s1 = smov 0   ;;  %s2819_s22 = smov 0  }
  0x18 LB: > { %3365 = sst [smem:[#allocation14_spill]] %s2673_s0  ;;  %s2840_s2 = sadd.s32 4294967295, %s2693_s22   ;;  %s2693_s22 = sphi %s2819_s22, %s39_s22   ;;  %s2689_s1 = sphi %s2817_s1, %s3405_s1   ;;  %s2685_s21 = sphi %s2815_s21, %s3404_s21   ;;  %s2681_s20 = sphi %s2813_s20, %s3403_s20   ;;  %s2677_s30 = sphi %s2811_s30, %s3402_s30   ;;  %s2673_s0 = sphi %s2809_s0, %s3401_s0  }
  0x19   : > { %3366 = sst [smem:[#allocation15_spill]] %s2685_s21  ;;  %s3345_s23 = sadd.s32 4294967294, %s2693_s22  }
  0x1a   : > { %3367 = sst [smem:[#allocation16_spill]] %s2840_s2  ;;  %s51_s24 = sadd.s32 1, %s2689_s1 }
  0x1b   : > { %s58_s25 = sadd.s32 1, %s2681_s20  ;;  %p53_p0 = scmp.ge.s32.totalorder %s51_s24, 2 }
  0x1c   : > { %p65_p1 = scmp.ne.s32.totalorder %s2681_s20, %s2677_s30  ;;  %p66_p2 = scmp.eq.s32.totalorder %s2693_s22, 0 }
  0x1d   : > { %p71_p3 = scmp.ne.s32.totalorder %s2677_s30, %s2673_s0  ;;  %s3407_s24 = smov (%p53_p0, %s51_s24), 0 }
  0x1e   : > { %3368 = sst [smem:[#allocation17_spill]] %s3407_s24  ;;  %p2852_p4 = por %p66_p2, %p65_p1 }
  0x1f   : > { %p72_p5 = scmp.eq.s32.totalorder %s2840_s2, 0  ;;  %s55_s26 = ssub.s32 %s2689_s1, %s3407_s24 }
  0x20   : > { %p433_p6 = scmp.eq.s32.totalorder %s2840_s2, 1  ;;  %p56_p7 = scmp.eq.s32.totalorder %s55_s26, 0 }
  0x21   : > { %p2860_p8 = por %p72_p5, %p71_p3  ;;  %p439_p10 = scmp.eq.s32.totalorder %s3345_s23, 1 }
  0x22   : > { %p2864_p9 = por %p433_p6, %p65_p1  ;;  %p2447_p13 = scmp.lt.s32.totalorder %s2693_s22, 2 }
  0x23   : > { %s2871_s29 = scalar_select %p56_p7, %s2681_s20, %s58_s25  }
  0x24   : > { %p2873_p11 = por %p439_p10, %p71_p3  ;;  %s559_s26 = sand.u32 1, %s2681_s20  }
  0x25   : > { %3372 = sst [smem:[#allocation18_spill]] %s2871_s29  ;;  %s2179_s24 = sshll.u32 %s559_s26, 3 }
  0x26   : > { %s3373_s0 = scalar_select %p2873_p11, 1, 0 }
  0x27   : > { %s2180_s17 = sshll.u32 %s2689_s1, 7  ;;  %s3374_s18 = sld [smem:[#allocation19_spill]] }
  0x28   : > { %s563_s2 = scalar_lea.vmem [#allocation4], %s2179_s24  ;;  %p2886_p0 = pnand %p2447_p13, %p2852_p4 }
  0x29   : > { %s570_s14 = sshll.u32 %s563_s2, 4  ;;  %p2181_p1 = scmp.ge.s32.totalorder %s2693_s22, 1  ;;  %s571_s14 = int_to_ptr.vmem [resolvable:$true] %s570_s14 }
  0x2a   : > { %p575_p2 = scmp.lt.s32.totalorder %s2693_s22, 3  ;;  %s560_s23 = scalar_lea.sflag [#allocation5], %s559_s26 }
  0x2b   : > { %p2531_p3 = pneg %p2886_p0  ;;  %s2542_s29 = scalar_lea.vmem %s571_s14, 128 }
  0x2c   : > { %p2543_p5 = scmp.ne.s32.totalorder %s571_s14, %s2542_s29  ;;  %s2695_s16 = smov [#allocation4]  }
  0x2d   : > { %s568_s21 = scalar_lea.hbm %s3374_s18, %s2180_s17  ;;  %s2547_s17 = sshll.u32 %s2695_s16, 4  ;;  %s2548_s17 = int_to_ptr.vmem [resolvable:$false] %s2547_s17 }
  0x2e   : > { %p2545_p6 = pnand %p2543_p5, %p2531_p3  ;;  %s2549_s18 = scalar_lea.vmem %s2548_s17, 256 }
  0x2f   : > { %p2550_p10 = scmp.lt.s32.totalorder %s571_s14, %s2548_s17  ;;  %p2551_p12 = scmp.lt.s32.totalorder %s2549_s18, %s2542_s29 }
  0x30   : > { %p2546_p7 = pneg %p2545_p6 }
  0x31   : > { %p2552_p4 = por %p2551_p12, %p2550_p10 }
  0x33   : > { %p2553_p13 = pnand %p2552_p4, %p2546_p7 }
  0x35   : > { %2556 = shalt.err (!%p2553_p13)
}
  0x36   : > { %2436 = dma.hbm_to_vmem [thread:$0]  (!%p2886_p0), %s568_s21, 128, %s571_s14, %s560_s23  }
  0x37   : > { %p576_p11 = pnand %p2181_p1, %p575_p2 }
  0x38   : > { %s2901_s19 = sand.u32 (!%p576_p11), 1, %s2677_s30  }
  0x39   : > { %579 = sbr.rel (%p576_p11) target bundleno = 2316 (0x90c), region = 88  ;;  %s3346_s2 = sshll.u32 (!%p576_p11), %s2901_s19, 3 }
  0x3a   : > { %s582_s24 = scalar_lea.sflag (!%p576_p11), [#allocation5], %s2901_s19  ;;  %s585_s3 = scalar_lea.vmem (!%p576_p11), [#allocation4], %s3346_s2 }
  0x3e   : > { %2660 = dma.done.wait (%p2860_p8), %s582_s24, 128  }
  0x3f   : > { %2662 = vsyncadd (%p2860_p8), %s582_s24, 4294967168  ;;  %vm658_vm0 = vcmask 261120   ;;  %v2911_v0 = vld [vmem:[%s585_s3] sm:$0xff]  ;;  %s3376_s6 = sld [smem:[#allocation25_spill]]  ;;  %v2696_v8 = vmov 0.0   ;;  %vm2697_vm1 = vmmov 0   ;;  %v977_v53 = vlaneseq }
  0x40   : > { %v659_v1 = vsel %vm658_vm0, %v2911_v0, 0.0  ;;  %2295 = vmatprep.subr.mxu1 %v2696_v8  ;;  %2303 = vmatprep.mubr.msk.f32.mxu1 %vm2697_vm1, %v2696_v8  ;;  %s3377_s24 = sld [smem:[#allocation20_spill]]  ;;  %s2184_s25 = sshll.u32 %s2901_s19, 5  ;;  %vm853_vm2 = vcmask 64512   ;;  %v2190_v34 = vld [vmem:[%s3328_s10] ss:$0 sm:$0xff] }
  0x41   : > { %660 = vadd.xlane.f32.xlu0 %v659_v1  ;;  %2338 = vmatprep.subr.mxu0 %v2696_v8  ;;  %s3378_s21 = sld [smem:[#allocation21_spill]]  ;;  %s2991_s18 = scalar_lea.vmem [#allocation8], %s2184_s25  ;;  %v978_v54 = vshrl.u32 %v977_v53, 7  ;;  %v982_v55 = vand.u32 127, %v977_v53  ;;  %v2701_v57 = vmov -1e+09  }
  0x42   : > { %2340 = vmatprep.mubr.msk.f32.mxu0 %vm2697_vm1, %v2696_v8  ;;  %s3379_s7 = sld [smem:[#allocation26_spill]]  ;;  %s2699_s3 = smov 120   ;;  %vm1322_vm4 = vcmask 130112   ;;  %vm1495_vm5 = vcmask 195712   ;;  %vm1668_vm6 = vcmask 261312  }
  0x43   : > { %s3380_s5 = sld [smem:[#allocation24_spill]]  ;;  %s2700_s23 = smov 112   ;;  %vm983_vm3 = vcmp.ge.s32.totalorder %v978_v54, %v982_v55  ;;  %v1672_v54 = vld [vmem:[%s3329_s11 + $0x8] sm:$0xff] }
  0x44   : > { %s3381_s9 = sld [smem:[#allocation28_spill]]  ;;  %s3004_s27 = scalar_lea.vmem [#allocation10], %s2184_s25  ;;  %v984_v58 = vsel %vm983_vm3, 0.0, %v2701_v57  ;;  %v1671_v57 = vld [vmem:[%s3329_s11] sm:$0xff] }
  0x45   : > { %v691_v7 = vld [vmem:[%s3376_s6 + $0x18] sm:$0xff]  ;;  %v690_v9 = vld [vmem:[%s3376_s6 + $0x10] sm:$0xff]  ;;  %v689_v10 = vld [vmem:[%s3376_s6 + $0x8] sm:$0xff]  ;;  %s3382_s8 = sld [smem:[#allocation27_spill]]  ;;  %s3347_s29 = smov 8  }
  0x46   : > { %2296 = vmatpush3.msra.mxu1 %v691_v7  ;;  %v688_v11 = vld [vmem:[%s3376_s6] sm:$0xff]  ;;  %s2703_s26 = smov 16   ;;  %s2704_s25 = smov 24  }
  0x47   : > { %2297 = vmatprep.subr.mxu1 %v2696_v8  ;;  %v2186_v16 = vld [vmem:[%s3377_s24] ss:$0 sm:$0xff]  ;;  %s2698_s24 = smov 104   ;;  %s3384_s4 = sld [smem:[#allocation23_spill]] }
  0x48   : > { %2298 = vmatpush3.msra.mxu1 %v690_v9  ;;  %v2187_v18 = vld [vmem:[%s3378_s21] ss:$0 sm:$0xff]  ;;  %v775_v21 = vld [vmem:[%s3379_s7 + $0x18] sm:$0xff]  ;;  %v774_v22 = vld [vmem:[%s3379_s7 + $0x10] sm:$0xff]  ;;  %s3385_s14 = sld [smem:[#allocation29_spill]] }
  0x49   : > { %2299 = vmatprep.subr.mxu1 %v2696_v8  ;;  %v773_v23 = vld [vmem:[%s3379_s7 + $0x8] sm:$0xff]  ;;  %v772_v24 = vld [vmem:[%s3379_s7] sm:$0xff]  ;;  %v895_v25 = vld [vmem:[%s3380_s5 + $0x18] sm:$0xff]  ;;  %s3386_s21 = sld [smem:[#allocation16_spill]] }
  0x4a   : > { %2300 = vmatpush3.msra.mxu1 %v689_v10  ;;  %v894_v26 = vld [vmem:[%s3380_s5 + $0x10] sm:$0xff]  ;;  %v893_v27 = vld [vmem:[%s3380_s5 + $0x8] sm:$0xff]  ;;  %v892_v28 = vld [vmem:[%s3380_s5] sm:$0xff] }
  0x4b   : > { %2301 = vmatprep.subr.mxu1 %v2696_v8  ;;  %v2188_v30 = vld [vmem:[%s3381_s9] ss:$0 sm:$0xff] }
  0x4c   : > { %2302 = vmatpush3.msra.mxu1 %v688_v11  ;;  %v2198_v39 = vld [vmem:[%s3382_s8] ss:$0 sm:$0xff] }
  0x4d   : > { %2306 = vmatprep.subr.mxu1 %v2696_v8 }
  0xca   : > { %v661_v2 = vpop.xlane.xlu0 %660 }
  0xcb   : > { %v663_v3 = vmul.f32 0.03125, %v661_v2 }
  0xcd   : > { %v664_v4 = vsub.f32 %v2911_v0, %v663_v3 }
  0xcf   : > { %v665_v5 = vmul.f32 %v664_v4, %v664_v4 }
  0xd1   : > { %v666_v6 = vsel %vm658_vm0, %v665_v5, 0.0 }
  0xd2   : > { %667 = vadd.xlane.f32.xlu0 %v666_v6 }
 0x15b   : > { %v668_v12 = vpop.xlane.xlu0 %667 }
 0x15c   : > { %v669_v13 = vmul.f32 0.03125, %v668_v12 }
 0x15e   : > { %v670_v14 = vadd.f32 1e-05, %v669_v13 }
 0x160   : > { %2507 = vrsqrt.f32 %v670_v14 }
 0x16d   : > { %v2508_v15 = vpop.eup %2507 }
 0x16e   : > { %v672_v17 = vmul.f32 %v2508_v15, %v664_v4 }
 0x170   : > { %v679_v19 = vmul.f32 %v2186_v16, %v672_v17 }
 0x172   : > { %v686_v20 = vadd.f32 %v2187_v18, %v679_v19 }
 0x174   : > { %687 = vst.msk [vmem:[#allocation2] sm:$0xff] %vm658_vm0, %v686_v20  ;;  %2304 = vmatmul.mubr.msk.f32.vlgmr.msra.gmra.mxu1 %vm658_vm0, %v686_v20 }
 0x175   : > { %2307 = vmatpush3.msra.mxu1 %v775_v21  ;;  %2314 = vmatprep.mubr.msk.f32.mxu1 %vm2697_vm1, %v2696_v8 }
 0x176   : > { %2308 = vmatprep.subr.mxu1 %v2696_v8 }
 0x177   : > { %2309 = vmatpush3.msra.mxu1 %v774_v22 }
 0x178   : > { %2310 = vmatprep.subr.mxu1 %v2696_v8 }
 0x179   : > { %2311 = vmatpush3.msra.mxu1 %v773_v23 }
 0x17a   : > { %2312 = vmatprep.subr.mxu1 %v2696_v8 }
 0x17b   : > { %2313 = vmatpush3.msra.mxu1 %v772_v24  ;;  %v891_v29 = vld [vmem:[#allocation2] sm:$0xff] }
 0x17c   : > { %2315 = vmatmul.mubr.msk.f32.vlgmr.msra.gmra.mxu1 %vm658_vm0, %v686_v20  ;;  %2317 = vmatprep.subr.mxu1 %v2696_v8 }
 0x17d   : > { %2318 = vmatpush3.msra.mxu1 %v895_v25  ;;  %2325 = vmatprep.mubr.msk.f32.mxu1 %vm2697_vm1, %v2696_v8 }
 0x17e   : > { %2319 = vmatprep.subr.mxu1 %v2696_v8 }
 0x17f   : > { %2320 = vmatpush3.msra.mxu1 %v894_v26 }
 0x180   : > { %2321 = vmatprep.subr.mxu1 %v2696_v8 }
 0x181   : > { %2322 = vmatpush3.msra.mxu1 %v893_v27 }
 0x182   : > { %2323 = vmatprep.subr.mxu1 %v2696_v8 }
 0x183   : > { %2324 = vmatpush3.msra.mxu1 %v892_v28 }
 0x184   : > { %2326 = vmatmul.mubr.msk.f32.vlgmr.msra.gmra.mxu1 %vm658_vm0, %v891_v29  ;;  %2328 = vmatprep.subr.mxu1 %v2696_v8 }
 0x185   : > { %2330 = vmatprep.mubr.msk.f32.mxu1 %vm2697_vm1, %v2696_v8 }
 0x234   : > { %v768_v31 = vpop.f32.mrf.mxu1 }
 0x235   : > { %v769_v32 = vadd.f32 %v2188_v30, %v768_v31 }
 0x236   : > { %v2305_v33 = vpop.f32.mrf.mxu1 }
 0x237   : > { %854 = vst.msk [vmem:[%s2991_s18] sm:$0xff] %vm853_vm2, %v769_v32  ;;  %878 = vrot.lane.b32.xlu0 %v769_v32, %s2698_s24  ;;  %857 = vrot.lane.b32.xlu1 %v769_v32, %s2699_s3 }
 0x23b   : > { %868 = vrot.lane.b32.xlu1 %v769_v32, %s2700_s23 }
 0x23c   : > { %v849_v35 = vpop.f32.mrf.mxu1 }
 0x23d   : > { %v3001_v36 = vadd.f32 %v2190_v34, %v849_v35 }
 0x23e   : > { %v2316_v37 = vpop.f32.mrf.mxu1  ;;  %v985_v38 = vld [vmem:[%s2991_s18] sm:$0xff] }
 0x23f   : > { %855 = vst.msk [vmem:[%s3004_s27] sm:$0xff] %vm853_vm2, %v3001_v36  ;;  %2329 = vmatpush3.xpose.msk.msra.mxu1 %vm853_vm2, %v985_v38 }
 0x240   : > { %2333 = vmatprep.subr.mxu1 %v2696_v8 }
 0x244   : > { %v973_v40 = vpop.f32.mrf.mxu1 }
 0x245   : > { %v974_v41 = vadd.f32 %v2198_v39, %v973_v40 }
 0x246   : > { %v2327_v42 = vpop.f32.mrf.mxu1  ;;  %v986_v43 = vld [vmem:[%s3004_s27] sm:$0xff] }
 0x247   : > { %1155 = vrot.lane.b32.xlu1 %v974_v41, %s2699_s3  ;;  %2331 = vmatmul.mubr.msk.f32.vlgmr.msra.gmra.mxu1 %vm853_vm2, %v974_v41 }
 0x248   : > { %2334 = vmatpush3.msra.mxu1 %v986_v43  ;;  %2335 = vmatprep.mubr.msk.f32.mxu1 %vm2697_vm1, %v2696_v8 }
 0x249   : > { %2343 = vmatprep.subr.mxu1 %v2696_v8 }
 0x24b   : > { %1328 = vrot.lane.b32.xlu1 %v974_v41, %s2700_s23 }
 0x24f   : > { %1501 = vrot.lane.b32.xlu1 %v974_v41, %s2698_s24 }
 0x2a9   : > { %v879_v44 = vpop.permute.xlu0 %878  ;;  %v858_v45 = vpop.permute.xlu1 %857 }
 0x2aa   : > { %2196 = vst.msk [vmem:[%s2991_s18 + $0x18] sm:$0xff] %vm853_vm2, %v879_v44  ;;  %2192 = vst.msk [vmem:[%s2991_s18 + $0x8] sm:$0xff] %vm853_vm2, %v858_v45 }
 0x2ad   : > { %v869_v46 = vpop.permute.xlu1 %868 }
 0x2ae   : > { %2194 = vst.msk [vmem:[%s2991_s18 + $0x10] sm:$0xff] %vm853_vm2, %v869_v46 }
 0x2b1   : > { %v2203_v47 = vld [vmem:[%s2991_s18 + $0x8] sm:$0xff]  ;;  %v2213_v51 = vld [vmem:[%s2991_s18 + $0x18] sm:$0xff] }
 0x2b2   : > { %2339 = vmatpush3.xpose.msk.msra.mxu0 %vm853_vm2, %v2203_v47 }
 0x2b3   : > { %2348 = vmatprep.subr.mxu0 %v2696_v8 }
 0x2b5   : > { %v2208_v49 = vld [vmem:[%s2991_s18 + $0x10] sm:$0xff] }
 0x2b9   : > { %v1156_v48 = vpop.permute.xlu1 %1155 }
 0x2ba   : > { %2341 = vmatmul.mubr.msk.f32.vlgmr.msra.gmra.mxu0 %vm853_vm2, %v1156_v48 }
 0x2bb   : > { %2349 = vmatpush3.xpose.msk.msra.mxu0 %vm853_vm2, %v2208_v49  ;;  %2350 = vmatprep.mubr.msk.f32.mxu0 %vm2697_vm1, %v2696_v8 }
 0x2bc   : > { %2358 = vmatprep.subr.mxu0 %v2696_v8 }
 0x2bd   : > { %v1329_v50 = vpop.permute.xlu1 %1328 }
 0x2be   : > { %2351 = vmatmul.mubr.msk.f32.vlgmr.msra.gmra.mxu0 %vm853_vm2, %v1329_v50  ;;  %v1674_v50 = vld [vmem:[%s3329_s11 + $0x18] sm:$0xff] }
 0x2bf   : > { %2359 = vmatpush3.xpose.msk.msra.mxu0 %vm853_vm2, %v2213_v51  ;;  %2360 = vmatprep.mubr.msk.f32.mxu0 %vm2697_vm1, %v2696_v8  ;;  %v1673_v51 = vld [vmem:[%s3329_s11 + $0x10] sm:$0xff] }
 0x2c0   : > { %2368 = vmatprep.subr.mxu0 %v2696_v8 }
 0x2c1   : > { %v1502_v52 = vpop.permute.xlu1 %1501 }
 0x2c2   : > { %2361 = vmatmul.mubr.msk.f32.vlgmr.msra.gmra.mxu0 %vm853_vm2, %v1502_v52 }
 0x2c3   : > { %2376 = vmatprep.mubr.msk.f32.mxu0 %vm2697_vm1, %v2696_v8  ;;  %2369 = vmatpush3.msra.mxu0 %v1674_v50 }
 0x2c4   : > { %2370 = vmatprep.subr.mxu0 %v2696_v8 }
 0x2c5   : > { %2371 = vmatpush3.msra.mxu0 %v1673_v51 }
 0x2c6   : > { %2372 = vmatprep.subr.mxu0 %v2696_v8 }
 0x2c7   : > { %2373 = vmatpush3.msra.mxu0 %v1672_v54 }
 0x2c8   : > { %2374 = vmatprep.subr.mxu0 %v2696_v8 }
 0x2c9   : > { %2375 = vmatpush3.msra.mxu0 %v1671_v57 }
 0x2ca   : > { %2390 = vmatprep.subr.mxu0 %v2696_v8 }
 0x307   : > { %v1060_v56 = vpop.f32.mrf.mxu1 }
 0x308   : > { %v1064_v59 = vmul.f32 0.35355338, %v1060_v56 }
 0x309   : > { %v2332_v60 = vpop.f32.mrf.mxu1 }
 0x30a   : > { %v1065_v61 = vadd.f32 %v1064_v59, %v984_v58 }
 0x30c   : > { %v1066_v62 = vsel %vm853_vm2, %v1065_v61, -inf }
 0x30d   : > { %1067 = vmax.xlane.f32.xlu1 %v1066_v62 }
 0x31e   : > { %873 = vrot.lane.b32.xlu1 %v3001_v36, %s2700_s23  ;;  %s3387_s23 = sld [smem:[#allocation15_spill]] }
 0x37a   : > { %v1228_v63 = vpop.f32.mrf.mxu0 }
 0x37b   : > { %v1232_v1 = vmul.f32 0.35355338, %v1228_v63 }
 0x37c   : > { %v2342_v2 = vpop.f32.mrf.mxu0 }
 0x37d   : > { %v1233_v3 = vadd.f32 %v1232_v1, %v984_v58 }
 0x37e   : > { %v1401_v4 = vpop.f32.mrf.mxu0 }
 0x37f   : > { %v1405_v5 = vmul.f32 0.35355338, %v1401_v4  ;;  %v1234_v6 = vsel %vm853_vm2, %v1233_v3, -inf }
 0x380   : > { %1235 = vmax.xlane.f32.xlu0 %v1234_v6  ;;  %v2352_v7 = vpop.f32.mrf.mxu0 }
 0x381   : > { %v1406_v9 = vadd.f32 %v1405_v5, %v984_v58  ;;  %v2218_v7 = vld [vmem:[%s3330_s12] ss:$0 sm:$0xff] }
 0x382   : > { %v1574_v10 = vpop.f32.mrf.mxu0 }
 0x383   : > { %v1578_v11 = vmul.f32 0.35355338, %v1574_v10  ;;  %v1407_v12 = vsel %vm853_vm2, %v1406_v9, -inf }
 0x384   : > { %v2362_v13 = vpop.f32.mrf.mxu0  ;;  %1408 = vmax.xlane.f32.xlu1 %v1407_v12 }
 0x385   : > { %v1579_v14 = vadd.f32 %v1578_v11, %v984_v58 }
 0x387   : > { %v1580_v15 = vsel %vm853_vm2, %v1579_v14, -inf }
 0x388   : > { %1581 = vmax.xlane.f32.xlu1 %v1580_v15 }
 0x396   : > { %863 = vrot.lane.b32.xlu0 %v3001_v36, %s2699_s3  ;;  %v1068_v16 = vpop.xlane.xlu1 %1067  ;;  %s3383_s3 = sld [smem:[#allocation22_spill]] }
 0x397   : > { %v1069_v17 = vsub.f32 %v1065_v61, %v1068_v16 }
 0x399   : > { %v1070_v18 = vmul.f32 1.442695, %v1069_v17  ;;  %883 = vrot.lane.b32.xlu1 %v3001_v36, %s2698_s24  ;;  %s3388_s24 = sld [smem:[#allocation32_spill]] }
 0x39a   : > { %v874_v19 = vpop.permute.xlu1 %873 }
 0x39b   : > { %2509 = vpow2.f32 %v1070_v18  ;;  %2195 = vst.msk [vmem:[%s3004_s27 + $0x10] sm:$0xff] %vm853_vm2, %v874_v19  ;;  %v1789_v19 = vld [vmem:[%s3331_s13 + $0x18] sm:$0xff] }
 0x3a2   : > { %v2209_v34 = vld [vmem:[%s3004_s27 + $0x10] sm:$0xff] }
 0x3a8   : > { %v2510_v20 = vpop.eup %2509 }
 0x3a9   : > { %2336 = vmatmul.mubr.msk.f32.vlgmr.msra.gmra.mxu1 %vm853_vm2, %v2510_v20  ;;  %v1072_v41 = vsel %vm853_vm2, %v2510_v20, 0.0  ;;  %v1787_v20 = vld [vmem:[%s3331_s13 + $0x8] sm:$0xff] }
 0x3aa   : > { %2345 = vmatprep.mubr.msk.f32.mxu1 %vm2697_vm1, %v2696_v8 }
 0x409   : > { %v1236_v21 = vpop.xlane.xlu0 %1235 }
 0x40a   : > { %v1237_v22 = vsub.f32 %v1233_v3, %v1236_v21  ;;  %v1786_v21 = vld [vmem:[%s3331_s13] sm:$0xff] }
 0x40c   : > { %v1238_v23 = vmul.f32 1.442695, %v1237_v22 }
 0x40d   : > { %v864_v24 = vpop.permute.xlu0 %863  ;;  %v1409_v25 = vpop.xlane.xlu1 %1408 }
 0x40e   : > { %2511 = vpow2.f32 %v1238_v23  ;;  %2193 = vst.msk [vmem:[%s3004_s27 + $0x8] sm:$0xff] %vm853_vm2, %v864_v24  ;;  %v1410_v26 = vsub.f32 %v1406_v9, %v1409_v25 }
 0x410   : > { %v1411_v27 = vmul.f32 1.442695, %v1410_v26  ;;  %v2220_v26 = vld [vmem:[%s3383_s3] ss:$0 sm:$0xff] }
 0x411   : > { %v1582_v28 = vpop.xlane.xlu1 %1581 }
 0x412   : > { %2513 = vpow2.f32 %v1411_v27  ;;  %v1583_v29 = vsub.f32 %v1579_v14, %v1582_v28  ;;  %v2221_v28 = vld [vmem:[%s3384_s4] ss:$0 sm:$0xff] }
 0x414   : > { %v1584_v30 = vmul.f32 1.442695, %v1583_v29 }
 0x415   : > { %v884_v31 = vpop.permute.xlu1 %883  ;;  %v2204_v32 = vld [vmem:[%s3004_s27 + $0x8] sm:$0xff] }
 0x416   : > { %2515 = vpow2.f32 %v1584_v30  ;;  %2197 = vst.msk [vmem:[%s3004_s27 + $0x18] sm:$0xff] %vm853_vm2, %v884_v31  ;;  %2344 = vmatpush3.msra.mxu1 %v2204_v32  ;;  %v1894_v31 = vld [vmem:[%s3333_s15 + $0x78] sm:$0xff]  ;;  %v1893_v32 = vld [vmem:[%s3333_s15 + $0x70] sm:$0xff] }
 0x417   : > { %2353 = vmatprep.subr.mxu1 %v2696_v8 }
 0x41b   : > { %v2512_v33 = vpop.eup %2511 }
 0x41c   : > { %2346 = vmatmul.mubr.msk.f32.vlgmr.msra.gmra.mxu1 %vm853_vm2, %v2512_v33  ;;  %v1240_v35 = vsel %vm853_vm2, %v2512_v33, 0.0  ;;  %v1892_v33 = vld [vmem:[%s3333_s15 + $0x68] sm:$0xff] }
 0x41d   : > { %2354 = vmatpush3.msra.mxu1 %v2209_v34  ;;  %1241 = vadd.xlane.f32.xlu0 %v1240_v35  ;;  %v2214_v37 = vld [vmem:[%s3004_s27 + $0x18] sm:$0xff]  ;;  %v1891_v34 = vld [vmem:[%s3333_s15 + $0x60] sm:$0xff]  ;;  %v1890_v35 = vld [vmem:[%s3333_s15 + $0x58] sm:$0xff] }
 0x41e   : > { %2355 = vmatprep.mubr.msk.f32.mxu1 %vm2697_vm1, %v2696_v8  ;;  %2363 = vmatprep.subr.mxu1 %v2696_v8 }
 0x41f   : > { %v2514_v36 = vpop.eup %2513 }
 0x420   : > { %2356 = vmatmul.mubr.msk.f32.vlgmr.msra.gmra.mxu1 %vm853_vm2, %v2514_v36  ;;  %v1413_v38 = vsel %vm853_vm2, %v2514_v36, 0.0  ;;  %v1889_v36 = vld [vmem:[%s3333_s15 + $0x50] sm:$0xff] }
 0x421   : > { %2364 = vmatpush3.msra.mxu1 %v2214_v37  ;;  %1414 = vadd.xlane.f32.xlu1 %v1413_v38  ;;  %v1888_v37 = vld [vmem:[%s3333_s15 + $0x48] sm:$0xff]  ;;  %v1887_v38 = vld [vmem:[%s3333_s15 + $0x40] sm:$0xff] }
 0x422   : > { %2365 = vmatprep.mubr.msk.f32.mxu1 %vm2697_vm1, %v2696_v8  ;;  %2379 = vmatprep.subr.mxu1 %v2696_v8 }
 0x423   : > { %v2516_v39 = vpop.eup %2515 }
 0x424   : > { %2366 = vmatmul.mubr.msk.f32.vlgmr.msra.gmra.mxu1 %vm853_vm2, %v2516_v39  ;;  %v1586_v40 = vsel %vm853_vm2, %v2516_v39, 0.0  ;;  %v1886_v39 = vld [vmem:[%s3333_s15 + $0x38] sm:$0xff] }
 0x425   : > { %1587 = vadd.xlane.f32.xlu0 %v1586_v40  ;;  %2387 = vmatprep.mubr.msk.f32.mxu1 %vm2697_vm1, %v2696_v8  ;;  %v1885_v40 = vld [vmem:[%s3333_s15 + $0x30] sm:$0xff] }
 0x426   : > { %2380 = vmatpush3.msra.mxu1 %v1789_v19 }
 0x427   : > { %2381 = vmatprep.subr.mxu1 %v2696_v8 }
 0x429   : > { %1073 = vadd.xlane.f32.xlu0 %v1072_v41  ;;  %v1884_v41 = vld [vmem:[%s3333_s15 + $0x28] sm:$0xff] }
 0x469   : > { %v1144_v42 = vpop.f32.mrf.mxu1 }
 0x46b   : > { %v2337_v43 = vpop.f32.mrf.mxu1 }
 0x46c   : > { %v1882_v43 = vld [vmem:[%s3333_s15 + $0x18] sm:$0xff] }
 0x4a6   : > { %v1242_v44 = vpop.xlane.xlu0 %1241 }
 0x4aa   : > { %v1415_v49 = vpop.xlane.xlu1 %1414 }
 0x4ae   : > { %v1588_v45 = vpop.xlane.xlu0 %1587 }
 0x4b2   : > { %v1074_v46 = vpop.xlane.xlu0 %1073 }
 0x4b3   : > { %2517 = vrcp.f32 %v1074_v46  ;;  %v1879_v46 = vld [vmem:[%s3333_s15] sm:$0xff] }
 0x4b4   : > { %2519 = vrcp.f32 %v1242_v44  ;;  %v1881_v44 = vld [vmem:[%s3333_s15 + $0x10] sm:$0xff] }
 0x4b5   : > { %2521 = vrcp.f32 %v1415_v49 }
 0x4b6   : > { %2523 = vrcp.f32 %v1588_v45  ;;  %v1880_v45 = vld [vmem:[%s3333_s15 + $0x8] sm:$0xff] }
 0x4c0   : > { %v2518_v47 = vpop.eup %2517 }
 0x4c1   : > { %v1149_v48 = vmul.f32 %v2518_v47, %v1144_v42  ;;  %v2520_v52 = vpop.eup %2519  ;;  %v1883_v42 = vld [vmem:[%s3333_s15 + $0x20] sm:$0xff] }
 0x4c2   : > { %v2522_v58 = vpop.eup %2521  ;;  %v2222_v47 = vld [vmem:[%s3385_s14] ss:$0 sm:$0xff]  ;;  %s2012_s14 = sshll.u32 %s2991_s18, 4  ;;  %s3213_s14 = int_to_ptr.vmem [resolvable:$true] %s2012_s14 }
 0x4c3   : > { %1150 = vst.msk [vmem:[#allocation3] sm:$0xff] %vm853_vm2, %v1149_v48  ;;  %v2524_v62 = vpop.eup %2523 }
 0x4dc   : > { %v1312_v53 = vpop.f32.mrf.mxu1 }
 0x4dd   : > { %v1317_v55 = vmul.f32 %v2520_v52, %v1312_v53 }
 0x4de   : > { %v2347_v56 = vpop.f32.mrf.mxu1 }
 0x4df   : > { %1319 = vrot.lane.b32.xlu1 %v1317_v55, %s3347_s29  ;;  %s2557_s29 = scalar_lea.vmem %s3213_s14, 512 }
 0x4e0   : > { %v1485_v59 = vpop.f32.mrf.mxu1  ;;  %p2558_p8 = scmp.ne.s32.totalorder %s3213_s14, %s2557_s29 }
 0x4e1   : > { %v1490_v60 = vmul.f32 %v2522_v58, %v1485_v59 }
 0x4e2   : > { %v2357_v61 = vpop.f32.mrf.mxu1  ;;  %p2559_p11 = pnand %p2558_p8, %p2864_p9 }
 0x4e3   : > { %1492 = vrot.lane.b32.xlu0 %v1490_v60, %s2703_s26  ;;  %s1979_s26 = sand.u32 1, %s3386_s21   ;;  %s2705_s21 = smov [#allocation8]  }
 0x4e4   : > { %v1658_v63 = vpop.f32.mrf.mxu1  ;;  %s3215_s2 = scalar_lea.sflag [#allocation9], %s1979_s26  ;;  %p2560_p12 = pneg %p2559_p11 }
 0x4e5   : > { %v1663_v1 = vmul.f32 %v2524_v62, %v1658_v63  ;;  %s2561_s4 = sshll.u32 %s2705_s21, 4  ;;  %s2562_s4 = int_to_ptr.vmem [resolvable:$false] %s2561_s4 }
 0x4e6   : > { %v2367_v2 = vpop.f32.mrf.mxu1  ;;  %s2563_s5 = scalar_lea.vmem %s2562_s4, 1024  ;;  %p2564_p0 = scmp.lt.s32.totalorder %s3213_s14, %s2562_s4 }
 0x4e7   : > { %1665 = vrot.lane.b32.xlu1 %v1663_v1, %s2704_s25  ;;  %s3349_s25 = sshll.u32 %s3387_s23, 9  ;;  %p2565_p1 = scmp.lt.s32.totalorder %s2563_s5, %s2557_s29 }
 0x4e8   : > { %s3210_s3 = scalar_lea.hbm %s3388_s24, %s3349_s25 }
 0x4e9   : > { %p2566_p2 = por %p2565_p1, %p2564_p0 }
 0x4eb   : > { %p2567_p3 = pnand %p2566_p2, %p2560_p12 }
 0x551   : > { %v1320_v3 = vpop.permute.xlu1 %1319 }
 0x552   : > { %1323 = vst.msk [vmem:[#allocation3] sm:$0xff] %vm1322_vm4, %v1320_v3 }
 0x555   : > { %v1493_v4 = vpop.permute.xlu0 %1492 }
 0x556   : > { %1496 = vst.msk [vmem:[#allocation3] sm:$0xff] %vm1495_vm5, %v1493_v4 }
 0x559   : > { %v1666_v5 = vpop.permute.xlu1 %1665 }
 0x55a   : > { %1669 = vst.msk [vmem:[#allocation3] sm:$0xff] %vm1668_vm6, %v1666_v5 }
 0x561   : > { %v1670_v6 = vld [vmem:[#allocation3] sm:$0xff] }
 0x562   : > { %2377 = vmatmul.mubr.msk.f32.vlgmr.msra.gmra.mxu0 %vm658_vm0, %v1670_v6 }
 0x563   : > { %2422 = vmatprep.mubr.msk.f32.mxu0 %vm2697_vm1, %v2696_v8  ;;  %2391 = vmatpush3.msra.mxu0 %v1894_v31 }
 0x564   : > { %2392 = vmatprep.subr.mxu0 %v2696_v8 }
 0x565   : > { %2393 = vmatpush3.msra.mxu0 %v1893_v32 }
 0x566   : > { %2394 = vmatprep.subr.mxu0 %v2696_v8 }
 0x567   : > { %2395 = vmatpush3.msra.mxu0 %v1892_v33 }
 0x568   : > { %2396 = vmatprep.subr.mxu0 %v2696_v8 }
 0x569   : > { %2397 = vmatpush3.msra.mxu0 %v1891_v34 }
 0x56a   : > { %2398 = vmatprep.subr.mxu0 %v2696_v8 }
 0x56b   : > { %2399 = vmatpush3.msra.mxu0 %v1890_v35 }
 0x56c   : > { %2400 = vmatprep.subr.mxu0 %v2696_v8 }
 0x56d   : > { %2401 = vmatpush3.msra.mxu0 %v1889_v36 }
 0x56e   : > { %2402 = vmatprep.subr.mxu0 %v2696_v8 }
 0x56f   : > { %2403 = vmatpush3.msra.mxu0 %v1888_v37 }
 0x570   : > { %2404 = vmatprep.subr.mxu0 %v2696_v8 }
 0x571   : > { %2405 = vmatpush3.msra.mxu0 %v1887_v38 }
 0x572   : > { %2406 = vmatprep.subr.mxu0 %v2696_v8 }
 0x573   : > { %2407 = vmatpush3.msra.mxu0 %v1886_v39 }
 0x574   : > { %2408 = vmatprep.subr.mxu0 %v2696_v8 }
 0x575   : > { %2409 = vmatpush3.msra.mxu0 %v1885_v40 }
 0x576   : > { %2410 = vmatprep.subr.mxu0 %v2696_v8 }
 0x577   : > { %2411 = vmatpush3.msra.mxu0 %v1884_v41 }
 0x578   : > { %2412 = vmatprep.subr.mxu0 %v2696_v8 }
 0x579   : > { %2413 = vmatpush3.msra.mxu0 %v1883_v42 }
 0x57a   : > { %2414 = vmatprep.subr.mxu0 %v2696_v8 }
 0x57b   : > { %2415 = vmatpush3.msra.mxu0 %v1882_v43 }
 0x57c   : > { %2416 = vmatprep.subr.mxu0 %v2696_v8 }
 0x57d   : > { %2417 = vmatpush3.msra.mxu0 %v1881_v44 }
 0x57e   : > { %2418 = vmatprep.subr.mxu0 %v2696_v8 }
 0x57f   : > { %2419 = vmatpush3.msra.mxu0 %v1880_v45 }
 0x580   : > { %2420 = vmatprep.subr.mxu0 %v2696_v8 }
 0x581   : > { %2421 = vmatpush3.msra.mxu0 %v1879_v46 }
 0x622   : > { %v1751_v9 = vpop.f32.mrf.mxu0 }
 0x623   : > { %v1752_v10 = vadd.f32 %v2218_v7, %v1751_v9 }
 0x624   : > { %v2378_v11 = vpop.f32.mrf.mxu0 }
 0x625   : > { %v3109_v12 = vadd.f32 %v1752_v10, %v2911_v0  ;;  %v1788_v0 = vld [vmem:[%s3331_s13 + $0x10] sm:$0xff] }
 0x626   : > { %2382 = vmatpush3.msra.mxu1 %v1788_v0 }
 0x627   : > { %v1758_v13 = vsel %vm658_vm0, %v3109_v12, 0.0  ;;  %2383 = vmatprep.subr.mxu1 %v2696_v8 }
 0x628   : > { %1759 = vadd.xlane.f32.xlu1 %v1758_v13  ;;  %2384 = vmatpush3.msra.mxu1 %v1787_v20 }
 0x629   : > { %2385 = vmatprep.subr.mxu1 %v2696_v8 }
 0x62a   : > { %2386 = vmatpush3.msra.mxu1 %v1786_v21 }
 0x6b1   : > { %v1760_v14 = vpop.xlane.xlu1 %1759 }
 0x6b2   : > { %v1762_v15 = vmul.f32 0.03125, %v1760_v14 }
 0x6b4   : > { %v1763_v16 = vsub.f32 %v3109_v12, %v1762_v15 }
 0x6b6   : > { %v1764_v17 = vmul.f32 %v1763_v16, %v1763_v16 }
 0x6b8   : > { %v1765_v18 = vsel %vm658_vm0, %v1764_v17, 0.0 }
 0x6b9   : > { %1766 = vadd.xlane.f32.xlu0 %v1765_v18 }
 0x742   : > { %v1767_v22 = vpop.xlane.xlu0 %1766 }
 0x743   : > { %v1768_v23 = vmul.f32 0.03125, %v1767_v22 }
 0x745   : > { %v1769_v24 = vadd.f32 1e-05, %v1768_v23 }
 0x747   : > { %2525 = vrsqrt.f32 %v1769_v24 }
 0x754   : > { %v2526_v25 = vpop.eup %2525 }
 0x755   : > { %v1771_v27 = vmul.f32 %v2526_v25, %v1763_v16 }
 0x757   : > { %v1778_v29 = vmul.f32 %v2220_v26, %v1771_v27 }
 0x759   : > { %v1785_v30 = vadd.f32 %v2221_v28, %v1778_v29 }
 0x75b   : > { %2388 = vmatmul.mubr.msk.f32.vlgmr.msra.gmra.mxu1 %vm658_vm0, %v1785_v30 }
 0x81b   : > { %v1866_v48 = vpop.f32.mrf.mxu1 }
 0x81c   : > { %v1867_v49 = vadd.f32 %v2222_v47, %v1866_v48 }
 0x81d   : > { %v2389_v50 = vpop.f32.mrf.mxu1 }
 0x81e   : > { %v1871_v51 = vmul.f32 0.044715, %v1867_v49  ;;  %v1870_v56 = vmul.f32 0.5, %v1867_v49 }
 0x820   : > { %v1872_v52 = vmul.f32 %v1871_v51, %v1867_v49 }
 0x822   : > { %v1873_v53 = vmul.f32 %v1872_v52, %v1867_v49 }
 0x824   : > { %v1874_v54 = vadd.f32 %v1873_v53, %v1867_v49 }
 0x826   : > { %v1875_v55 = vmul.f32 0.7978846, %v1874_v54 }
 0x828   : > { %2527 = vtanh.f32 %v1875_v55 }
 0x835   : > { %v2528_v8 = vpop.eup %2527 }
 0x836   : > { %v1877_v57 = vadd.f32 1.0, %v2528_v8 }
 0x838   : > { %v1878_v58 = vmul.f32 %v1877_v57, %v1870_v56 }
 0x83a   : > { %2423 = vmatmul.mubr.f32.vlgmr.msra.gmra.mxu0 %v1878_v58 }
 0x83b   : > { %2570 = shalt.err (!%p2567_p3)
}
 0x83c   : > { %s2571_s18 = scalar_lea.hbm %s3210_s3, 512  ;;  %s2575_s17 = scalar_lea.hbm %s3388_s24, 1024 }
 0x83d   : > { %p2572_p5 = scmp.ne.s32.totalorder %s3210_s3, %s2571_s18  ;;  %p2576_p10 = scmp.lt.s32.totalorder %s3210_s3, %s3388_s24 }
 0x83e   : > { %p2577_p4 = scmp.lt.s32.totalorder %s2575_s17, %s2571_s18 }
 0x83f   : > { %p2573_p6 = pnand %p2572_p5, %p2864_p9 }
 0x840   : > { %p2578_p13 = por %p2577_p4, %p2576_p10 }
 0x841   : > { %p2574_p7 = pneg %p2573_p6 }
 0x843   : > { %p2579_p8 = pnand %p2578_p13, %p2574_p7 }
 0x845   : > { %2582 = shalt.err (!%p2579_p8)
}
 0x846   : > { %s2706_s4 = smov 128   ;;  %s3389_s5 = smov 8  }
 0x847   : > { %2428 = dma.vmem_to_hbm [thread:$0]  (%p2864_p9), %s3213_s14, 512, %s3210_s3, %s3215_s2, %s2706_s4, %s2706_s4, %s3389_s5  }
 0x848   : > { %s3390_s29 = sshll.u32 %s3387_s23, 9  ;;  %s3391_s18 = sld [smem:[#allocation33_spill]] }
 0x849   : > { %s2028_s17 = sshll.u32 %s3004_s27, 4  ;;  %s2707_s6 = smov [#allocation10]   ;;  %s2029_s17 = int_to_ptr.vmem [resolvable:$true] %s2028_s17 }
 0x84a   : > { %s2583_s21 = scalar_lea.vmem %s2029_s17, 512  ;;  %s2587_s7 = sshll.u32 %s2707_s6, 4  ;;  %s2588_s7 = int_to_ptr.vmem [resolvable:$false] %s2587_s7 }
 0x84b   : > { %p2584_p11 = scmp.ne.s32.totalorder %s2029_s17, %s2583_s21  ;;  %s2589_s8 = scalar_lea.vmem %s2588_s7, 1024 }
 0x84c   : > { %p2590_p1 = scmp.lt.s32.totalorder %s2029_s17, %s2588_s7  ;;  %p2591_p2 = scmp.lt.s32.totalorder %s2589_s8, %s2583_s21 }
 0x84d   : > { %p2585_p12 = pnand %p2584_p11, %p2864_p9 }
 0x84e   : > { %s3246_s16 = scalar_lea.hbm %s3391_s18, %s3390_s29  ;;  %p2592_p3 = por %p2591_p2, %p2590_p1 }
 0x84f   : > { %p2586_p0 = pneg %p2585_p12 }
 0x851   : > { %p2593_p5 = pnand %p2592_p3, %p2586_p0 }
 0x853   : > { %2596 = shalt.err (!%p2593_p5)
}
 0x854   : > { %s2597_s27 = scalar_lea.hbm %s3246_s16, 512  ;;  %s2601_s6 = scalar_lea.hbm %s3391_s18, 1024 }
 0x855   : > { %p2598_p6 = scmp.ne.s32.totalorder %s3246_s16, %s2597_s27  ;;  %p2602_p4 = scmp.lt.s32.totalorder %s3246_s16, %s3391_s18 }
 0x856   : > { %p2603_p13 = scmp.lt.s32.totalorder %s2601_s6, %s2597_s27 }
 0x857   : > { %p2599_p7 = pnand %p2598_p6, %p2864_p9 }
 0x858   : > { %p2604_p8 = por %p2603_p13, %p2602_p4 }
 0x859   : > { %p2600_p10 = pneg %p2599_p7 }
 0x85b   : > { %p2605_p11 = pnand %p2604_p8, %p2600_p10 }
 0x85d   : > { %2608 = shalt.err (!%p2605_p11)
}
 0x85e   : > { %2429 = dma.vmem_to_hbm [thread:$0]  (%p2864_p9), %s2029_s17, 512, %s3246_s16, %s3215_s2, %s2706_s4, %s2706_s4, %s3389_s5  }
 0x85f   : > { %s3392_s26 = sld [smem:[#allocation30_spill]]  ;;  %s2228_s21 = sshll.u32 %s3387_s23, 7 }
 0x860   : > { %s3393_s27 = sshll.u32 %s2901_s19, 3  ;;  %s3394_s25 = sld [smem:[#allocation31_spill]] }
 0x861   : > { %s635_s3 = scalar_lea.vmem [#allocation7], %s3393_s27  ;;  %s1975_s2 = scalar_lea.sflag [#allocation6], %s2901_s19 }
 0x862   : > { %s1999_s14 = sshll.u32 %s635_s3, 4  ;;  %s2708_s23 = smov [#allocation7]   ;;  %s2000_s14 = int_to_ptr.vmem [resolvable:$true] %s1999_s14 }
 0x863   : > { %s2609_s4 = scalar_lea.vmem %s2000_s14, 128  ;;  %s2613_s5 = sshll.u32 %s2708_s23, 4  ;;  %s2614_s5 = int_to_ptr.vmem [resolvable:$false] %s2613_s5 }
 0x864   : > { %p2610_p12 = scmp.ne.s32.totalorder %s2000_s14, %s2609_s4  ;;  %s2615_s16 = scalar_lea.vmem %s2614_s5, 256 }
 0x865   : > { %v2224_v59 = vld [vmem:[%s3392_s26] ss:$0 sm:$0xff]  ;;  %p2616_p2 = scmp.lt.s32.totalorder %s2000_s14, %s2614_s5  ;;  %p2617_p3 = scmp.lt.s32.totalorder %s2615_s16, %s2609_s4 }
 0x866   : > { %s1997_s9 = scalar_lea.hbm %s3394_s25, %s2228_s21  ;;  %p2611_p0 = pnand %p2610_p12, %p2864_p9 }
 0x867   : > { %p2618_p5 = por %p2617_p3, %p2616_p2 }
 0x868   : > { %p2612_p1 = pneg %p2611_p0 }
 0x86a   : > { %p2619_p6 = pnand %p2618_p5, %p2612_p1 }
 0x8fa   : > { %v1968_v60 = vpop.f32.mrf.mxu0 }
 0x8fb   : > { %v1969_v61 = vadd.f32 %v2224_v59, %v1968_v60 }
 0x8fc   : > { %v2424_v62 = vpop.f32.mrf.mxu0 }
 0x8fd   : > { %v1972_v63 = vadd.f32 %v1969_v61, %v3109_v12 }
 0x8ff   : > { %1973 = vst.msk [vmem:[%s635_s3] sm:$0xff] %vm658_vm0, %v1972_v63 }
 0x900   : > { %2622 = shalt.err (!%p2619_p6)
}
 0x901   : > { %s2623_s17 = scalar_lea.hbm %s1997_s9, 128  ;;  %s2627_s8 = scalar_lea.hbm %s3394_s25, 256 }
 0x902   : > { %p2624_p7 = scmp.ne.s32.totalorder %s1997_s9, %s2623_s17  ;;  %p2628_p13 = scmp.lt.s32.totalorder %s1997_s9, %s3394_s25 }
 0x903   : > { %p2629_p8 = scmp.lt.s32.totalorder %s2627_s8, %s2623_s17 }
 0x904   : > { %p2625_p10 = pnand %p2624_p7, %p2864_p9 }
 0x905   : > { %p2630_p11 = por %p2629_p8, %p2628_p13 }
 0x906   : > { %p2626_p4 = pneg %p2625_p10 }
 0x908   : > { %p2631_p12 = pnand %p2630_p11, %p2626_p4 }
 0x90a   : > { %2634 = shalt.err (!%p2631_p12)
}
 0x90b   : > { %2427 = dma.vmem_to_hbm [thread:$0]  (%p2864_p9), %s2000_s14, 128, %s1997_s9, %s1975_s2  }
 0x90c PF: > { %s3395_s27 = sld [smem:[#allocation14_spill]]  ;;  %p3396_p0 = scmp.ne.s32.totalorder %s3373_s0, 0 }
 0x90d   : > { %p3397_p1 = scmp.ge.s32.totalorder %s2693_s22, 2 }
 0x90f   : > { %p2438_p2 = pnand %p3397_p1, %p3396_p0 }
 0x911   : > { %p2439_p3 = pneg %p2438_p2 }
 0x912   : > { %s2043_s3 = sand.u32 1, %s3395_s27  }
 0x913   : > { %s2044_s6 = scalar_lea.sflag [#allocation6], %s2043_s3 }
 0x914   : > { %2664 = dma.done.wait (%p2439_p3), %s2044_s6, 128  }
 0x915   : > { %2666 = vsyncadd (%p2439_p3), %s2044_s6, 4294967168  ;;  %s3398_s29 = sadd.s32 4294967294, %s2693_s22  }
 0x916   : > { %s2052_s4 = sand.u32 1, %s3398_s29  }
 0x917   : > { %s2053_s23 = scalar_lea.sflag [#allocation9], %s2052_s4 }
 0x918   : > { %2668 = dma.done.wait (%p2439_p3), %s2053_s23, 1024  }
 0x919   : > { %2670 = vsyncadd (%p2439_p3), %s2053_s23, 4294966272  ;;  %s39_s22 = sadd.s32 1, %s2693_s22   ;;  %s3399_s9 = sld [smem:[#allocation18_spill]] }
 0x91a   : > { %p36_p9 = scmp.ge.s32.totalorder %s39_s22, 4   ;;  %s3400_s28 = sld [smem:[#allocation17_spill]] }
 0x91b   : > { %s3401_s0 = smov %s2677_s30  ;;  %s3402_s30 = smov %s2681_s20 }
 0x91c   : > { %s3404_s21 = smov %s2689_s1  ;;  %38 = sbr.rel (!%p36_p9) target bundleno = 24 (0x18), region = 183 }
 0x91f   : > { %s3403_s20 = smov %s3399_s9 }
 0x920   : > { %s3405_s1 = smov %s3400_s28 }
 0x921   :  { %2067 = vsyncpa [#allocation5], 1 }
 0x922   :  { %2069 = vsyncpa [#allocation5 + $0x1], 1 }
 0x923   :  { %2070 = vsyncpa [#allocation6], 1 }
 0x924   :  { %2072 = vsyncpa [#allocation6 + $0x1], 1 }
 0x925   :  { %2073 = vsyncpa [#allocation9], 1 }
 0x926   :  { %2075 = vsyncpa [#allocation9 + $0x1], 1 }

</bundles_post_ra>
